<compile_context>
chip_gen: v7x
topology: tpu7x:2x2x1
jax: 0.10.0
libtpu: 0.0.40
codegen_flags: <defaults>
</compile_context>

<pallas_src>
import numpy as np
import jax
import jax.numpy as jnp
from jax import lax
from jax.experimental import pallas as pl
from jax.experimental.pallas import tpu as pltpu


def _round_up(x, m):
    return (x + m - 1) // m * m


def _make_kernel(C, G, L, OFF, E, tap_offsets):
    """Fused residual-unit kernel. All sizes/offsets are static Python ints."""

    def kernel(x_ref, w1_ref, w2_ref, b1_ref, b2_ref, mask_ref, o_ref,
               xs_ref, a1_ref):
        # x_ref:    (G, C, E)     bf16  zero-padded images, valid lanes [OFF, OFF+Pp)
        # w1_ref:   (C, 9*C)      bf16  conv1 weights, taps stacked on contraction axis
        # w2_ref:   (C, 9*C)      bf16  conv2 weights, same layout
        # b1_ref:   (C, 1)        f32
        # b2_ref:   (C, 1)        f32
        # mask_ref: (1, L)        f32   1.0 at interior padded positions, else 0.0
        # o_ref:    (G, C, L)     f32
        # xs_ref:   (9*C, L)      bf16  scratch: stacked shifted taps (GEMM operand)
        # a1_ref:   (C, E)        bf16  scratch: staged elu(conv1) with halo margin

        # Zero ONLY the halo margins (interior [OFF, OFF+L) is fully rewritten for
        # every image). Done every grid step so it is correct regardless of how the
        # grid is sharded across cores; cost is a few hundred lanes of bf16 stores.
        a1_ref[:, :OFF] = jnp.zeros((C, OFF), jnp.bfloat16)
        a1_ref[:, OFF + L:] = jnp.zeros((C, E - OFF - L), jnp.bfloat16)

        w1 = w1_ref[...]
        w2 = w2_ref[...]
        b1 = b1_ref[...]
        b2 = b2_ref[...]
        msk = mask_ref[...]

        for g in range(G):  # static, unrolled loop over the packed images
            # ---- conv1: stack the 9 shifted taps once, ONE GEMM over K = 9*C ----
            for k, off in enumerate(tap_offsets):
                xs_ref[k * C:(k + 1) * C, :] = x_ref[g, :, OFF + off: OFF + off + L]
            y1 = jnp.dot(w1, xs_ref[...],
                         preferred_element_type=jnp.float32) + b1     # (C, L) f32

            # ELU (alpha=1) in f32; the mask reproduces the zero padding conv2 sees.
            a1 = jnp.where(y1 > 0.0, y1, jnp.exp(jnp.minimum(y1, 0.0)) - 1.0) * msk
            a1_ref[:, OFF:OFF + L] = a1.astype(jnp.bfloat16)

            # ---- conv2: restack from the halo'd activation, ONE GEMM ----
            for k, off in enumerate(tap_offsets):
                xs_ref[k * C:(k + 1) * C, :] = a1_ref[:, OFF + off: OFF + off + L]
            y2 = jnp.dot(w2, xs_ref[...],
                         preferred_element_type=jnp.float32) + b2     # (C, L) f32

            # residual add (+x) and ReLU, all in f32
            resid = x_ref[g, :, OFF:OFF + L].astype(jnp.float32)
            o_ref[g] = jnp.maximum(y2 + resid, 0.0)

    return kernel


def residual_unit_forward(x, conv1_w, conv1_b, conv2_w, conv2_b,
                          *, images_per_step=8):
    """relu(conv2(elu(conv1(x))) + x) — matches residualUnit.forward (nd=2)."""
    N, Cin, H, W = x.shape
    Cout = conv1_w.shape[0]
    assert conv1_w.shape == (Cout, Cin, 3, 3)
    assert conv2_w.shape == (Cout, Cout, 3, 3)
    assert Cin == Cout, "residual add requires in_size == out_size"

    Hp, Wp = H + 2, W + 2                  # zero-padded spatial extent (pad=1)
    Pp = Hp * Wp                           # flattened padded pixels per image
    L = _round_up(Pp, 128)                 # lane-dense compute extent
    M = Wp + 1                             # max |tap offset| in flattened units
    OFF = _round_up(max(M, 1), 128)        # aligned start of valid lanes (>= halo)
    E = _round_up(OFF + L + M, 128)        # extended extent (room for shifted reads)
    C = _round_up(Cin, 8)                  # sublane-aligned channel count
    tap_offsets = [(kh - 1) * Wp + (kw - 1) for kh in range(3) for kw in range(3)]

    # ---- pick G (images packed per grid step) so blocks fit comfortably ----
    per_img = C * E * 2 + C * L * 4        # bf16 input + f32 output per image
    budget = 40 << 20                      # conservative across v5e/v6e/v7x
    G = int(max(1, min(N, images_per_step, budget // (2 * max(per_img, 1)))))
    Npad = _round_up(N, G)

    # --- cheap wrapper-side prep (no 9x im2col):
    #     zero-pad spatially, pad channels->C, pad batch->Npad, flatten, embed, bf16
    xp = jnp.pad(x.astype(jnp.float32),
                 ((0, Npad - N), (0, C - Cin), (1, 1), (1, 1)))
    xp = xp.reshape(Npad, C, Pp)
    x_ext = jnp.pad(xp, ((0, 0), (0, 0), (OFF, E - OFF - Pp))).astype(jnp.bfloat16)

    # Flattened per-tap weights: w_flat[co, (kh*3+kw)*C + ci] = w[co, ci, kh, kw],
    # zero-padded on both channel axes to C (padded channels contribute nothing).
    def pack_w(w):
        wp_ = jnp.zeros((C, C, 3, 3), jnp.float32)
        wp_ = wp_.at[:Cout, :Cin].set(w.astype(jnp.float32))
        return jnp.transpose(wp_, (0, 2, 3, 1)).reshape(C, 9 * C).astype(jnp.bfloat16)

    w1_flat = pack_w(conv1_w)
    w2_flat = pack_w(conv2_w)
    b1c = jnp.zeros((C, 1), jnp.float32).at[:Cout, 0].set(conv1_b.astype(jnp.float32))
    b2c = jnp.zeros((C, 1), jnp.float32).at[:Cout, 0].set(conv2_b.astype(jnp.float32))

    # interior mask over the L compute lanes (1.0 at real output positions)
    q = jnp.arange(L, dtype=jnp.int32)
    hp, wp = q // Wp, q % Wp
    interior = (q < Pp) & (hp >= 1) & (hp <= H) & (wp >= 1) & (wp <= W)
    mask = interior.astype(jnp.float32).reshape(1, L)

    kernel = _make_kernel(C, G, L, OFF, E, tap_offsets)

    grid_spec = pltpu.PrefetchScalarGridSpec(
        num_scalar_prefetch=0,
        grid=(Npad // G,),
        in_specs=[
            pl.BlockSpec((G, C, E), lambda n: (n, 0, 0)),      # packed padded images
            pl.BlockSpec((C, 9 * C), lambda n: (0, 0)),        # conv1 weights (resident)
            pl.BlockSpec((C, 9 * C), lambda n: (0, 0)),        # conv2 weights (resident)
            pl.BlockSpec((C, 1), lambda n: (0, 0)),            # bias1
            pl.BlockSpec((C, 1), lambda n: (0, 0)),            # bias2
            pl.BlockSpec((1, L), lambda n: (0, 0)),            # interior mask
        ],
        out_specs=pl.BlockSpec((G, C, L), lambda n: (n, 0, 0)),
        scratch_shapes=[
            pltpu.VMEM((9 * C, L), jnp.bfloat16),              # stacked-tap GEMM operand
            pltpu.VMEM((C, E), jnp.bfloat16),                  # staged elu(conv1) + halo
        ],
    )

    # Explicit VMEM budget: double-buffered image/output blocks + resident consts
    # + scratch, with headroom.  Capped at 48 MiB so it stays valid on v7x (64 MiB).
    const_bytes = 2 * (C * 9 * C * 2) + 2 * (C * 4) + L * 4
    block_bytes = G * C * E * 2 + G * C * L * 4
    scratch_bytes = 9 * C * L * 2 + C * E * 2
    need = 2 * (block_bytes + const_bytes) + scratch_bytes + (2 << 20)
    vmem_limit = int(min(max(need, 32 << 20), 48 << 20))

    cost = pl.CostEstimate(
        flops=int(2 * 2 * Npad * C * (9 * C) * L),             # two convs (MACs*2)
        transcendentals=int(Npad * C * L),                     # exp in ELU
        bytes_accessed=int(x_ext.size * 2 + Npad * C * L * 4
                           + 2 * (C * 9 * C * 2)),
    )

    out_flat = pl.pallas_call(
        kernel,
        out_shape=jax.ShapeDtypeStruct((Npad, C, L), jnp.float32),
        grid_spec=grid_spec,
        compiler_params=pltpu.CompilerParams(
            # batch-chunk axis is embarrassingly parallel
            dimension_semantics=("parallel",),
            vmem_limit_bytes=vmem_limit),
        cost_estimate=cost,
    )(x_ext, w1_flat, w2_flat, b1c, b2c, mask)

    # drop pad images / pad channels / junk lanes, back to NCHW
    out = (out_flat[:N, :Cout, :Pp]
           .reshape(N, Cout, Hp, Wp)[:, :, 1:H + 1, 1:W + 1])
    return out


if __name__ == "__main__":
    key = jax.random.PRNGKey(0)
    k_x, k_w1, k_w2 = jax.random.split(key, 3)

    N, Cc, H, W = 2, 4, 16, 16
    x = jax.random.normal(k_x, (N, Cc, H, W), jnp.float32)

    # conv params as in conv23DUnit.__init__: xavier_uniform(gain=sqrt(2)), bias=0
    fan = Cc * 3 * 3
    bound = float(np.sqrt(2.0) * np.sqrt(6.0 / (fan + fan)))
    conv1_w = jax.random.uniform(k_w1, (Cc, Cc, 3, 3), jnp.float32, -bound, bound)
    conv2_w = jax.random.uniform(k_w2, (Cc, Cc, 3, 3), jnp.float32, -bound, bound)
    conv1_b = jnp.zeros((Cc,), jnp.float32)
    conv2_b = jnp.zeros((Cc,), jnp.float32)

    out = jax.block_until_ready(
        residual_unit_forward(x, conv1_w, conv1_b, conv2_w, conv2_b))

    # Pure-JAX reference. The kernel feeds the MXU bf16 operands (per the perf
    # guidance), so the reference uses the same bf16-rounded activations/weights;
    # all accumulation and element-wise math stays f32 in both.
    def qz(a):
        return a.astype(jnp.bfloat16).astype(jnp.float32)

    def conv3x3(a, w, b):
        y = lax.conv_general_dilated(
            a, w, window_strides=(1, 1), padding=((1, 1), (1, 1)),
            dimension_numbers=("NCHW", "OIHW", "NCHW"),
            precision=lax.Precision.HIGHEST,
            preferred_element_type=jnp.float32)
        return y + b[None, :, None, None]

    y1 = conv3x3(qz(x), qz(conv1_w), conv1_b)
    a1 = jnp.where(y1 > 0.0, y1, jnp.exp(jnp.minimum(y1, 0.0)) - 1.0)   # ELU
    y2 = conv3x3(qz(a1), qz(conv2_w), conv2_b)
    ref = jnp.maximum(y2 + qz(x), 0.0)

    assert out.shape == (N, Cc, H, W)
    np.testing.assert_allclose(np.asarray(out), np.asarray(ref),
                               atol=5e-3, rtol=5e-3)
    print("KERNEL_OK")
</pallas_src>

<mosaic_0001>
module attributes {stable_mosaic.version = 11 : i64} {
  func.func @kernel(%arg0: i32, %arg1: memref<2x8x640xbf16, #tpu.memory_space<vmem>>, %arg2: memref<8x72xbf16, #tpu.memory_space<vmem>>, %arg3: memref<8x72xbf16, #tpu.memory_space<vmem>>, %arg4: memref<8x1xf32, #tpu.memory_space<vmem>>, %arg5: memref<8x1xf32, #tpu.memory_space<vmem>>, %arg6: memref<1x384xf32, #tpu.memory_space<vmem>>, %arg7: memref<2x8x384xf32, #tpu.memory_space<vmem>>, %arg8: memref<72x384xbf16, #tpu.memory_space<vmem>>, %arg9: memref<8x640xbf16, #tpu.memory_space<vmem>>) attributes {dimension_semantics = [#tpu.dimension_semantics<parallel>], iteration_bounds = array<i64: 1>, scalar_prefetch = 0 : i64, scratch_operands = 2 : i64, tpu.core_type = #tpu.core_type<tc>, window_params = [{transform_indices = @transform_0, window_bounds = array<i64: 2, 8, 640>}, {pipeline_mode = #tpu.pipeline_mode<synchronous>, transform_indices = @transform_1, window_bounds = array<i64: 8, 72>}, {pipeline_mode = #tpu.pipeline_mode<synchronous>, transform_indices = @transform_2, window_bounds = array<i64: 8, 72>}, {pipeline_mode = #tpu.pipeline_mode<synchronous>, transform_indices = @transform_3, window_bounds = array<i64: 8, 1>}, {pipeline_mode = #tpu.pipeline_mode<synchronous>, transform_indices = @transform_4, window_bounds = array<i64: 8, 1>}, {pipeline_mode = #tpu.pipeline_mode<synchronous>, transform_indices = @transform_5, window_bounds = array<i64: 1, 384>}, {transform_indices = @transform_6, window_bounds = array<i64: 2, 8, 384>}]} {
    %cst = arith.constant 0.000000e+00 : bf16
    %0 = vector.broadcast %cst : bf16 to vector<8x128xbf16>
    %c0 = arith.constant 0 : index
    %c0_0 = arith.constant 0 : index
    %1 = vector.load %arg9[%c0, %c0_0] : memref<8x640xbf16, #tpu.memory_space<vmem>>, vector<8x128xbf16>
    tpu.vector_store %arg9[%c0, %c0_0], %0 {strides = array<i32>} : memref<8x640xbf16, #tpu.memory_space<vmem>>, vector<8x128xbf16>,
    %cst_1 = arith.constant 0.000000e+00 : bf16
    %2 = vector.broadcast %cst_1 : bf16 to vector<8x128xbf16>
    %c0_2 = arith.constant 0 : index
    %c512 = arith.constant 512 : index
    %3 = vector.load %arg9[%c0_2, %c512] : memref<8x640xbf16, #tpu.memory_space<vmem>>, vector<8x128xbf16>
    tpu.vector_store %arg9[%c0_2, %c512], %2 {strides = array<i32>} : memref<8x640xbf16, #tpu.memory_space<vmem>>, vector<8x128xbf16>,
    %c0_3 = arith.constant 0 : index
    %c0_4 = arith.constant 0 : index
    %4 = vector.load %arg2[%c0_3, %c0_4] : memref<8x72xbf16, #tpu.memory_space<vmem>>, vector<8x72xbf16>
    %c0_5 = arith.constant 0 : index
    %c0_6 = arith.constant 0 : index
    %5 = vector.load %arg3[%c0_5, %c0_6] : memref<8x72xbf16, #tpu.memory_space<vmem>>, vector<8x72xbf16>
    %c0_7 = arith.constant 0 : index
    %c0_8 = arith.constant 0 : index
    %6 = vector.load %arg4[%c0_7, %c0_8] : memref<8x1xf32, #tpu.memory_space<vmem>>, vector<8x1xf32>
    %c0_9 = arith.constant 0 : index
    %c0_10 = arith.constant 0 : index
    %7 = vector.load %arg5[%c0_9, %c0_10] : memref<8x1xf32, #tpu.memory_space<vmem>>, vector<8x1xf32>
    %c0_11 = arith.constant 0 : index
    %c0_12 = arith.constant 0 : index
    %8 = vector.load %arg6[%c0_11, %c0_12] : memref<1x384xf32, #tpu.memory_space<vmem>>, vector<1x384xf32>
    %c0_13 = arith.constant 0 : index
    %c0_14 = arith.constant 0 : index
    %c109 = arith.constant 109 : index
    %9 = vector.load %arg1[%c0_13, %c0_14, %c109] : memref<2x8x640xbf16, #tpu.memory_space<vmem>>, vector<1x8x384xbf16>
    %10 = vector.shape_cast %9 : vector<1x8x384xbf16> to vector<8x384xbf16>
    %c0_15 = arith.constant 0 : index
    %c0_16 = arith.constant 0 : index
    %11 = vector.load %arg8[%c0_15, %c0_16] : memref<72x384xbf16, #tpu.memory_space<vmem>>, vector<8x384xbf16>
    tpu.vector_store %arg8[%c0_15, %c0_16], %10 {strides = array<i32>} : memref<72x384xbf16, #tpu.memory_space<vmem>>, vector<8x384xbf16>,
    %c0_17 = arith.constant 0 : index
    %c0_18 = arith.constant 0 : index
    %c110 = arith.constant 110 : index
    %12 = vector.load %arg1[%c0_17, %c0_18, %c110] : memref<2x8x640xbf16, #tpu.memory_space<vmem>>, vector<1x8x384xbf16>
    %13 = vector.shape_cast %12 : vector<1x8x384xbf16> to vector<8x384xbf16>
    %c8 = arith.constant 8 : index
    %c0_19 = arith.constant 0 : index
    %14 = vector.load %arg8[%c8, %c0_19] : memref<72x384xbf16, #tpu.memory_space<vmem>>, vector<8x384xbf16>
    tpu.vector_store %arg8[%c8, %c0_19], %13 {strides = array<i32>} : memref<72x384xbf16, #tpu.memory_space<vmem>>, vector<8x384xbf16>,
    %c0_20 = arith.constant 0 : index
    %c0_21 = arith.constant 0 : index
    %c111 = arith.constant 111 : index
    %15 = vector.load %arg1[%c0_20, %c0_21, %c111] : memref<2x8x640xbf16, #tpu.memory_space<vmem>>, vector<1x8x384xbf16>
    %16 = vector.shape_cast %15 : vector<1x8x384xbf16> to vector<8x384xbf16>
    %c16 = arith.constant 16 : index
    %c0_22 = arith.constant 0 : index
    %17 = vector.load %arg8[%c16, %c0_22] : memref<72x384xbf16, #tpu.memory_space<vmem>>, vector<8x384xbf16>
    tpu.vector_store %arg8[%c16, %c0_22], %16 {strides = array<i32>} : memref<72x384xbf16, #tpu.memory_space<vmem>>, vector<8x384xbf16>,
    %c0_23 = arith.constant 0 : index
    %c0_24 = arith.constant 0 : index
    %c127 = arith.constant 127 : index
    %18 = vector.load %arg1[%c0_23, %c0_24, %c127] : memref<2x8x640xbf16, #tpu.memory_space<vmem>>, vector<1x8x384xbf16>
    %19 = vector.shape_cast %18 : vector<1x8x384xbf16> to vector<8x384xbf16>
    %c24 = arith.constant 24 : index
    %c0_25 = arith.constant 0 : index
    %20 = vector.load %arg8[%c24, %c0_25] : memref<72x384xbf16, #tpu.memory_space<vmem>>, vector<8x384xbf16>
    tpu.vector_store %arg8[%c24, %c0_25], %19 {strides = array<i32>} : memref<72x384xbf16, #tpu.memory_space<vmem>>, vector<8x384xbf16>,
    %c0_26 = arith.constant 0 : index
    %c0_27 = arith.constant 0 : index
    %c128 = arith.constant 128 : index
    %21 = vector.load %arg1[%c0_26, %c0_27, %c128] : memref<2x8x640xbf16, #tpu.memory_space<vmem>>, vector<1x8x384xbf16>
    %22 = vector.shape_cast %21 : vector<1x8x384xbf16> to vector<8x384xbf16>
    %c32 = arith.constant 32 : index
    %c0_28 = arith.constant 0 : index
    %23 = vector.load %arg8[%c32, %c0_28] : memref<72x384xbf16, #tpu.memory_space<vmem>>, vector<8x384xbf16>
    tpu.vector_store %arg8[%c32, %c0_28], %22 {strides = array<i32>} : memref<72x384xbf16, #tpu.memory_space<vmem>>, vector<8x384xbf16>,
    %c0_29 = arith.constant 0 : index
    %c0_30 = arith.constant 0 : index
    %c129 = arith.constant 129 : index
    %24 = vector.load %arg1[%c0_29, %c0_30, %c129] : memref<2x8x640xbf16, #tpu.memory_space<vmem>>, vector<1x8x384xbf16>
    %25 = vector.shape_cast %24 : vector<1x8x384xbf16> to vector<8x384xbf16>
    %c40 = arith.constant 40 : index
    %c0_31 = arith.constant 0 : index
    %26 = vector.load %arg8[%c40, %c0_31] : memref<72x384xbf16, #tpu.memory_space<vmem>>, vector<8x384xbf16>
    tpu.vector_store %arg8[%c40, %c0_31], %25 {strides = array<i32>} : memref<72x384xbf16, #tpu.memory_space<vmem>>, vector<8x384xbf16>,
    %c0_32 = arith.constant 0 : index
    %c0_33 = arith.constant 0 : index
    %c145 = arith.constant 145 : index
    %27 = vector.load %arg1[%c0_32, %c0_33, %c145] : memref<2x8x640xbf16, #tpu.memory_space<vmem>>, vector<1x8x384xbf16>
    %28 = vector.shape_cast %27 : vector<1x8x384xbf16> to vector<8x384xbf16>
    %c48 = arith.constant 48 : index
    %c0_34 = arith.constant 0 : index
    %29 = vector.load %arg8[%c48, %c0_34] : memref<72x384xbf16, #tpu.memory_space<vmem>>, vector<8x384xbf16>
    tpu.vector_store %arg8[%c48, %c0_34], %28 {strides = array<i32>} : memref<72x384xbf16, #tpu.memory_space<vmem>>, vector<8x384xbf16>,
    %c0_35 = arith.constant 0 : index
    %c0_36 = arith.constant 0 : index
    %c146 = arith.constant 146 : index
    %30 = vector.load %arg1[%c0_35, %c0_36, %c146] : memref<2x8x640xbf16, #tpu.memory_space<vmem>>, vector<1x8x384xbf16>
    %31 = vector.shape_cast %30 : vector<1x8x384xbf16> to vector<8x384xbf16>
    %c56 = arith.constant 56 : index
    %c0_37 = arith.constant 0 : index
    %32 = vector.load %arg8[%c56, %c0_37] : memref<72x384xbf16, #tpu.memory_space<vmem>>, vector<8x384xbf16>
    tpu.vector_store %arg8[%c56, %c0_37], %31 {strides = array<i32>} : memref<72x384xbf16, #tpu.memory_space<vmem>>, vector<8x384xbf16>,
    %c0_38 = arith.constant 0 : index
    %c0_39 = arith.constant 0 : index
    %c147 = arith.constant 147 : index
    %33 = vector.load %arg1[%c0_38, %c0_39, %c147] : memref<2x8x640xbf16, #tpu.memory_space<vmem>>, vector<1x8x384xbf16>
    %34 = vector.shape_cast %33 : vector<1x8x384xbf16> to vector<8x384xbf16>
    %c64 = arith.constant 64 : index
    %c0_40 = arith.constant 0 : index
    %35 = vector.load %arg8[%c64, %c0_40] : memref<72x384xbf16, #tpu.memory_space<vmem>>, vector<8x384xbf16>
    tpu.vector_store %arg8[%c64, %c0_40], %34 {strides = array<i32>} : memref<72x384xbf16, #tpu.memory_space<vmem>>, vector<8x384xbf16>,
    %c0_41 = arith.constant 0 : index
    %c0_42 = arith.constant 0 : index
    %36 = vector.load %arg8[%c0_41, %c0_42] : memref<72x384xbf16, #tpu.memory_space<vmem>>, vector<72x384xbf16>
    %cst_43 = arith.constant dense<0.000000e+00> : vector<8x384xf32>
    %37 = tpu.matmul %4, %36, %cst_43 {dimension_numbers = #tpu.dot_dimension_numbers<[1], [0], [0], [1], [0, 0, 1, 1], [], []>} : vector<8x72xbf16>, vector<72x384xbf16>, vector<8x384xf32> -> vector<8x384xf32>
    %38 = vector.broadcast %6 : vector<8x1xf32> to vector<8x384xf32>
    %39 = arith.addf %37, %38 : vector<8x384xf32>
    %cst_44 = arith.constant 0.000000e+00 : f32
    %40 = vector.broadcast %cst_44 : f32 to vector<8x384xf32>
    %41 = arith.cmpf ogt, %39, %40 : vector<8x384xf32>
    %cst_45 = arith.constant 0.000000e+00 : f32
    %42 = vector.broadcast %cst_45 : f32 to vector<8x384xf32>
    %43 = arith.minimumf %39, %42 : vector<8x384xf32>
    %44 = math.exp %43 : vector<8x384xf32>
    %cst_46 = arith.constant 1.000000e+00 : f32
    %45 = vector.broadcast %cst_46 : f32 to vector<8x384xf32>
    %46 = arith.subf %44, %45 : vector<8x384xf32>
    %47 = arith.select %41, %39, %46 : vector<8x384xi1>, vector<8x384xf32>
    %48 = vector.broadcast %8 : vector<1x384xf32> to vector<8x384xf32>
    %49 = arith.mulf %47, %48 : vector<8x384xf32>
    %50 = arith.truncf %49 : vector<8x384xf32> to vector<8x384xbf16>
    %c0_47 = arith.constant 0 : index
    %c128_48 = arith.constant 128 : index
    %51 = vector.load %arg9[%c0_47, %c128_48] : memref<8x640xbf16, #tpu.memory_space<vmem>>, vector<8x384xbf16>
    tpu.vector_store %arg9[%c0_47, %c128_48], %50 {strides = array<i32>} : memref<8x640xbf16, #tpu.memory_space<vmem>>, vector<8x384xbf16>,
    %c0_49 = arith.constant 0 : index
    %c109_50 = arith.constant 109 : index
    %52 = vector.load %arg9[%c0_49, %c109_50] : memref<8x640xbf16, #tpu.memory_space<vmem>>, vector<8x384xbf16>
    %c0_51 = arith.constant 0 : index
    %c0_52 = arith.constant 0 : index
    %53 = vector.load %arg8[%c0_51, %c0_52] : memref<72x384xbf16, #tpu.memory_space<vmem>>, vector<8x384xbf16>
    tpu.vector_store %arg8[%c0_51, %c0_52], %52 {strides = array<i32>} : memref<72x384xbf16, #tpu.memory_space<vmem>>, vector<8x384xbf16>,
    %c0_53 = arith.constant 0 : index
    %c110_54 = arith.constant 110 : index
    %54 = vector.load %arg9[%c0_53, %c110_54] : memref<8x640xbf16, #tpu.memory_space<vmem>>, vector<8x384xbf16>
    %c8_55 = arith.constant 8 : index
    %c0_56 = arith.constant 0 : index
    %55 = vector.load %arg8[%c8_55, %c0_56] : memref<72x384xbf16, #tpu.memory_space<vmem>>, vector<8x384xbf16>
    tpu.vector_store %arg8[%c8_55, %c0_56], %54 {strides = array<i32>} : memref<72x384xbf16, #tpu.memory_space<vmem>>, vector<8x384xbf16>,
    %c0_57 = arith.constant 0 : index
    %c111_58 = arith.constant 111 : index
    %56 = vector.load %arg9[%c0_57, %c111_58] : memref<8x640xbf16, #tpu.memory_space<vmem>>, vector<8x384xbf16>
    %c16_59 = arith.constant 16 : index
    %c0_60 = arith.constant 0 : index
    %57 = vector.load %arg8[%c16_59, %c0_60] : memref<72x384xbf16, #tpu.memory_space<vmem>>, vector<8x384xbf16>
    tpu.vector_store %arg8[%c16_59, %c0_60], %56 {strides = array<i32>} : memref<72x384xbf16, #tpu.memory_space<vmem>>, vector<8x384xbf16>,
    %c0_61 = arith.constant 0 : index
    %c127_62 = arith.constant 127 : index
    %58 = vector.load %arg9[%c0_61, %c127_62] : memref<8x640xbf16, #tpu.memory_space<vmem>>, vector<8x384xbf16>
    %c24_63 = arith.constant 24 : index
    %c0_64 = arith.constant 0 : index
    %59 = vector.load %arg8[%c24_63, %c0_64] : memref<72x384xbf16, #tpu.memory_space<vmem>>, vector<8x384xbf16>
    tpu.vector_store %arg8[%c24_63, %c0_64], %58 {strides = array<i32>} : memref<72x384xbf16, #tpu.memory_space<vmem>>, vector<8x384xbf16>,
    %c0_65 = arith.constant 0 : index
    %c128_66 = arith.constant 128 : index
    %60 = vector.load %arg9[%c0_65, %c128_66] : memref<8x640xbf16, #tpu.memory_space<vmem>>, vector<8x384xbf16>
    %c32_67 = arith.constant 32 : index
    %c0_68 = arith.constant 0 : index
    %61 = vector.load %arg8[%c32_67, %c0_68] : memref<72x384xbf16, #tpu.memory_space<vmem>>, vector<8x384xbf16>
    tpu.vector_store %arg8[%c32_67, %c0_68], %60 {strides = array<i32>} : memref<72x384xbf16, #tpu.memory_space<vmem>>, vector<8x384xbf16>,
    %c0_69 = arith.constant 0 : index
    %c129_70 = arith.constant 129 : index
    %62 = vector.load %arg9[%c0_69, %c129_70] : memref<8x640xbf16, #tpu.memory_space<vmem>>, vector<8x384xbf16>
    %c40_71 = arith.constant 40 : index
    %c0_72 = arith.constant 0 : index
    %63 = vector.load %arg8[%c40_71, %c0_72] : memref<72x384xbf16, #tpu.memory_space<vmem>>, vector<8x384xbf16>
    tpu.vector_store %arg8[%c40_71, %c0_72], %62 {strides = array<i32>} : memref<72x384xbf16, #tpu.memory_space<vmem>>, vector<8x384xbf16>,
    %c0_73 = arith.constant 0 : index
    %c145_74 = arith.constant 145 : index
    %64 = vector.load %arg9[%c0_73, %c145_74] : memref<8x640xbf16, #tpu.memory_space<vmem>>, vector<8x384xbf16>
    %c48_75 = arith.constant 48 : index
    %c0_76 = arith.constant 0 : index
    %65 = vector.load %arg8[%c48_75, %c0_76] : memref<72x384xbf16, #tpu.memory_space<vmem>>, vector<8x384xbf16>
    tpu.vector_store %arg8[%c48_75, %c0_76], %64 {strides = array<i32>} : memref<72x384xbf16, #tpu.memory_space<vmem>>, vector<8x384xbf16>,
    %c0_77 = arith.constant 0 : index
    %c146_78 = arith.constant 146 : index
    %66 = vector.load %arg9[%c0_77, %c146_78] : memref<8x640xbf16, #tpu.memory_space<vmem>>, vector<8x384xbf16>
    %c56_79 = arith.constant 56 : index
    %c0_80 = arith.constant 0 : index
    %67 = vector.load %arg8[%c56_79, %c0_80] : memref<72x384xbf16, #tpu.memory_space<vmem>>, vector<8x384xbf16>
    tpu.vector_store %arg8[%c56_79, %c0_80], %66 {strides = array<i32>} : memref<72x384xbf16, #tpu.memory_space<vmem>>, vector<8x384xbf16>,
    %c0_81 = arith.constant 0 : index
    %c147_82 = arith.constant 147 : index
    %68 = vector.load %arg9[%c0_81, %c147_82] : memref<8x640xbf16, #tpu.memory_space<vmem>>, vector<8x384xbf16>
    %c64_83 = arith.constant 64 : index
    %c0_84 = arith.constant 0 : index
    %69 = vector.load %arg8[%c64_83, %c0_84] : memref<72x384xbf16, #tpu.memory_space<vmem>>, vector<8x384xbf16>
    tpu.vector_store %arg8[%c64_83, %c0_84], %68 {strides = array<i32>} : memref<72x384xbf16, #tpu.memory_space<vmem>>, vector<8x384xbf16>,
    %c0_85 = arith.constant 0 : index
    %c0_86 = arith.constant 0 : index
    %70 = vector.load %arg8[%c0_85, %c0_86] : memref<72x384xbf16, #tpu.memory_space<vmem>>, vector<72x384xbf16>
    %cst_87 = arith.constant dense<0.000000e+00> : vector<8x384xf32>
    %71 = tpu.matmul %5, %70, %cst_87 {dimension_numbers = #tpu.dot_dimension_numbers<[1], [0], [0], [1], [0, 0, 1, 1], [], []>} : vector<8x72xbf16>, vector<72x384xbf16>, vector<8x384xf32> -> vector<8x384xf32>
    %72 = vector.broadcast %7 : vector<8x1xf32> to vector<8x384xf32>
    %73 = arith.addf %71, %72 : vector<8x384xf32>
    %c0_88 = arith.constant 0 : index
    %c0_89 = arith.constant 0 : index
    %c128_90 = arith.constant 128 : index
    %74 = vector.load %arg1[%c0_88, %c0_89, %c128_90] : memref<2x8x640xbf16, #tpu.memory_space<vmem>>, vector<1x8x384xbf16>
    %75 = vector.shape_cast %74 : vector<1x8x384xbf16> to vector<8x384xbf16>
    %76 = arith.extf %75 : vector<8x384xbf16> to vector<8x384xf32>
    %77 = arith.addf %73, %76 : vector<8x384xf32>
    %cst_91 = arith.constant 0.000000e+00 : f32
    %78 = vector.broadcast %cst_91 : f32 to vector<8x384xf32>
    %79 = arith.maximumf %77, %78 : vector<8x384xf32>
    %c0_92 = arith.constant 0 : index
    %c0_93 = arith.constant 0 : index
    %c0_94 = arith.constant 0 : index
    %80 = vector.load %arg7[%c0_92, %c0_93, %c0_94] : memref<2x8x384xf32, #tpu.memory_space<vmem>>, vector<1x8x384xf32>
    %81 = vector.shape_cast %80 : vector<1x8x384xf32> to vector<8x384xf32>
    %82 = vector.shape_cast %79 : vector<8x384xf32> to vector<1x8x384xf32>
    tpu.vector_store %arg7[%c0_92, %c0_93, %c0_94], %82 {strides = array<i32>} : memref<2x8x384xf32, #tpu.memory_space<vmem>>, vector<1x8x384xf32>,
    %c1 = arith.constant 1 : index
    %c0_95 = arith.constant 0 : index
    %c109_96 = arith.constant 109 : index
    %83 = vector.load %arg1[%c1, %c0_95, %c109_96] : memref<2x8x640xbf16, #tpu.memory_space<vmem>>, vector<1x8x384xbf16>
    %84 = vector.shape_cast %83 : vector<1x8x384xbf16> to vector<8x384xbf16>
    %c0_97 = arith.constant 0 : index
    %c0_98 = arith.constant 0 : index
    %85 = vector.load %arg8[%c0_97, %c0_98] : memref<72x384xbf16, #tpu.memory_space<vmem>>, vector<8x384xbf16>
    tpu.vector_store %arg8[%c0_97, %c0_98], %84 {strides = array<i32>} : memref<72x384xbf16, #tpu.memory_space<vmem>>, vector<8x384xbf16>,
    %c1_99 = arith.constant 1 : index
    %c0_100 = arith.constant 0 : index
    %c110_101 = arith.constant 110 : index
    %86 = vector.load %arg1[%c1_99, %c0_100, %c110_101] : memref<2x8x640xbf16, #tpu.memory_space<vmem>>, vector<1x8x384xbf16>
    %87 = vector.shape_cast %86 : vector<1x8x384xbf16> to vector<8x384xbf16>
    %c8_102 = arith.constant 8 : index
    %c0_103 = arith.constant 0 : index
    %88 = vector.load %arg8[%c8_102, %c0_103] : memref<72x384xbf16, #tpu.memory_space<vmem>>, vector<8x384xbf16>
    tpu.vector_store %arg8[%c8_102, %c0_103], %87 {strides = array<i32>} : memref<72x384xbf16, #tpu.memory_space<vmem>>, vector<8x384xbf16>,
    %c1_104 = arith.constant 1 : index
    %c0_105 = arith.constant 0 : index
    %c111_106 = arith.constant 111 : index
    %89 = vector.load %arg1[%c1_104, %c0_105, %c111_106] : memref<2x8x640xbf16, #tpu.memory_space<vmem>>, vector<1x8x384xbf16>
    %90 = vector.shape_cast %89 : vector<1x8x384xbf16> to vector<8x384xbf16>
    %c16_107 = arith.constant 16 : index
    %c0_108 = arith.constant 0 : index
    %91 = vector.load %arg8[%c16_107, %c0_108] : memref<72x384xbf16, #tpu.memory_space<vmem>>, vector<8x384xbf16>
    tpu.vector_store %arg8[%c16_107, %c0_108], %90 {strides = array<i32>} : memref<72x384xbf16, #tpu.memory_space<vmem>>, vector<8x384xbf16>,
    %c1_109 = arith.constant 1 : index
    %c0_110 = arith.constant 0 : index
    %c127_111 = arith.constant 127 : index
    %92 = vector.load %arg1[%c1_109, %c0_110, %c127_111] : memref<2x8x640xbf16, #tpu.memory_space<vmem>>, vector<1x8x384xbf16>
    %93 = vector.shape_cast %92 : vector<1x8x384xbf16> to vector<8x384xbf16>
    %c24_112 = arith.constant 24 : index
    %c0_113 = arith.constant 0 : index
    %94 = vector.load %arg8[%c24_112, %c0_113] : memref<72x384xbf16, #tpu.memory_space<vmem>>, vector<8x384xbf16>
    tpu.vector_store %arg8[%c24_112, %c0_113], %93 {strides = array<i32>} : memref<72x384xbf16, #tpu.memory_space<vmem>>, vector<8x384xbf16>,
    %c1_114 = arith.constant 1 : index
    %c0_115 = arith.constant 0 : index
    %c128_116 = arith.constant 128 : index
    %95 = vector.load %arg1[%c1_114, %c0_115, %c128_116] : memref<2x8x640xbf16, #tpu.memory_space<vmem>>, vector<1x8x384xbf16>
    %96 = vector.shape_cast %95 : vector<1x8x384xbf16> to vector<8x384xbf16>
    %c32_117 = arith.constant 32 : index
    %c0_118 = arith.constant 0 : index
    %97 = vector.load %arg8[%c32_117, %c0_118] : memref<72x384xbf16, #tpu.memory_space<vmem>>, vector<8x384xbf16>
    tpu.vector_store %arg8[%c32_117, %c0_118], %96 {strides = array<i32>} : memref<72x384xbf16, #tpu.memory_space<vmem>>, vector<8x384xbf16>,
    %c1_119 = arith.constant 1 : index
    %c0_120 = arith.constant 0 : index
    %c129_121 = arith.constant 129 : index
    %98 = vector.load %arg1[%c1_119, %c0_120, %c129_121] : memref<2x8x640xbf16, #tpu.memory_space<vmem>>, vector<1x8x384xbf16>
    %99 = vector.shape_cast %98 : vector<1x8x384xbf16> to vector<8x384xbf16>
    %c40_122 = arith.constant 40 : index
    %c0_123 = arith.constant 0 : index
    %100 = vector.load %arg8[%c40_122, %c0_123] : memref<72x384xbf16, #tpu.memory_space<vmem>>, vector<8x384xbf16>
    tpu.vector_store %arg8[%c40_122, %c0_123], %99 {strides = array<i32>} : memref<72x384xbf16, #tpu.memory_space<vmem>>, vector<8x384xbf16>,
    %c1_124 = arith.constant 1 : index
    %c0_125 = arith.constant 0 : index
    %c145_126 = arith.constant 145 : index
    %101 = vector.load %arg1[%c1_124, %c0_125, %c145_126] : memref<2x8x640xbf16, #tpu.memory_space<vmem>>, vector<1x8x384xbf16>
    %102 = vector.shape_cast %101 : vector<1x8x384xbf16> to vector<8x384xbf16>
    %c48_127 = arith.constant 48 : index
    %c0_128 = arith.constant 0 : index
    %103 = vector.load %arg8[%c48_127, %c0_128] : memref<72x384xbf16, #tpu.memory_space<vmem>>, vector<8x384xbf16>
    tpu.vector_store %arg8[%c48_127, %c0_128], %102 {strides = array<i32>} : memref<72x384xbf16, #tpu.memory_space<vmem>>, vector<8x384xbf16>,
    %c1_129 = arith.constant 1 : index
    %c0_130 = arith.constant 0 : index
    %c146_131 = arith.constant 146 : index
    %104 = vector.load %arg1[%c1_129, %c0_130, %c146_131] : memref<2x8x640xbf16, #tpu.memory_space<vmem>>, vector<1x8x384xbf16>
    %105 = vector.shape_cast %104 : vector<1x8x384xbf16> to vector<8x384xbf16>
    %c56_132 = arith.constant 56 : index
    %c0_133 = arith.constant 0 : index
    %106 = vector.load %arg8[%c56_132, %c0_133] : memref<72x384xbf16, #tpu.memory_space<vmem>>, vector<8x384xbf16>
    tpu.vector_store %arg8[%c56_132, %c0_133], %105 {strides = array<i32>} : memref<72x384xbf16, #tpu.memory_space<vmem>>, vector<8x384xbf16>,
    %c1_134 = arith.constant 1 : index
    %c0_135 = arith.constant 0 : index
    %c147_136 = arith.constant 147 : index
    %107 = vector.load %arg1[%c1_134, %c0_135, %c147_136] : memref<2x8x640xbf16, #tpu.memory_space<vmem>>, vector<1x8x384xbf16>
    %108 = vector.shape_cast %107 : vector<1x8x384xbf16> to vector<8x384xbf16>
    %c64_137 = arith.constant 64 : index
    %c0_138 = arith.constant 0 : index
    %109 = vector.load %arg8[%c64_137, %c0_138] : memref<72x384xbf16, #tpu.memory_space<vmem>>, vector<8x384xbf16>
    tpu.vector_store %arg8[%c64_137, %c0_138], %108 {strides = array<i32>} : memref<72x384xbf16, #tpu.memory_space<vmem>>, vector<8x384xbf16>,
    %c0_139 = arith.constant 0 : index
    %c0_140 = arith.constant 0 : index
    %110 = vector.load %arg8[%c0_139, %c0_140] : memref<72x384xbf16, #tpu.memory_space<vmem>>, vector<72x384xbf16>
    %cst_141 = arith.constant dense<0.000000e+00> : vector<8x384xf32>
    %111 = tpu.matmul %4, %110, %cst_141 {dimension_numbers = #tpu.dot_dimension_numbers<[1], [0], [0], [1], [0, 0, 1, 1], [], []>} : vector<8x72xbf16>, vector<72x384xbf16>, vector<8x384xf32> -> vector<8x384xf32>
    %112 = vector.broadcast %6 : vector<8x1xf32> to vector<8x384xf32>
    %113 = arith.addf %111, %112 : vector<8x384xf32>
    %cst_142 = arith.constant 0.000000e+00 : f32
    %114 = vector.broadcast %cst_142 : f32 to vector<8x384xf32>
    %115 = arith.cmpf ogt, %113, %114 : vector<8x384xf32>
    %cst_143 = arith.constant 0.000000e+00 : f32
    %116 = vector.broadcast %cst_143 : f32 to vector<8x384xf32>
    %117 = arith.minimumf %113, %116 : vector<8x384xf32>
    %118 = math.exp %117 : vector<8x384xf32>
    %cst_144 = arith.constant 1.000000e+00 : f32
    %119 = vector.broadcast %cst_144 : f32 to vector<8x384xf32>
    %120 = arith.subf %118, %119 : vector<8x384xf32>
    %121 = arith.select %115, %113, %120 : vector<8x384xi1>, vector<8x384xf32>
    %122 = vector.broadcast %8 : vector<1x384xf32> to vector<8x384xf32>
    %123 = arith.mulf %121, %122 : vector<8x384xf32>
    %124 = arith.truncf %123 : vector<8x384xf32> to vector<8x384xbf16>
    %c0_145 = arith.constant 0 : index
    %c128_146 = arith.constant 128 : index
    %125 = vector.load %arg9[%c0_145, %c128_146] : memref<8x640xbf16, #tpu.memory_space<vmem>>, vector<8x384xbf16>
    tpu.vector_store %arg9[%c0_145, %c128_146], %124 {strides = array<i32>} : memref<8x640xbf16, #tpu.memory_space<vmem>>, vector<8x384xbf16>,
    %c0_147 = arith.constant 0 : index
    %c109_148 = arith.constant 109 : index
    %126 = vector.load %arg9[%c0_147, %c109_148] : memref<8x640xbf16, #tpu.memory_space<vmem>>, vector<8x384xbf16>
    %c0_149 = arith.constant 0 : index
    %c0_150 = arith.constant 0 : index
    %127 = vector.load %arg8[%c0_149, %c0_150] : memref<72x384xbf16, #tpu.memory_space<vmem>>, vector<8x384xbf16>
    tpu.vector_store %arg8[%c0_149, %c0_150], %126 {strides = array<i32>} : memref<72x384xbf16, #tpu.memory_space<vmem>>, vector<8x384xbf16>,
    %c0_151 = arith.constant 0 : index
    %c110_152 = arith.constant 110 : index
    %128 = vector.load %arg9[%c0_151, %c110_152] : memref<8x640xbf16, #tpu.memory_space<vmem>>, vector<8x384xbf16>
    %c8_153 = arith.constant 8 : index
    %c0_154 = arith.constant 0 : index
    %129 = vector.load %arg8[%c8_153, %c0_154] : memref<72x384xbf16, #tpu.memory_space<vmem>>, vector<8x384xbf16>
    tpu.vector_store %arg8[%c8_153, %c0_154], %128 {strides = array<i32>} : memref<72x384xbf16, #tpu.memory_space<vmem>>, vector<8x384xbf16>,
    %c0_155 = arith.constant 0 : index
    %c111_156 = arith.constant 111 : index
    %130 = vector.load %arg9[%c0_155, %c111_156] : memref<8x640xbf16, #tpu.memory_space<vmem>>, vector<8x384xbf16>
    %c16_157 = arith.constant 16 : index
    %c0_158 = arith.constant 0 : index
    %131 = vector.load %arg8[%c16_157, %c0_158] : memref<72x384xbf16, #tpu.memory_space<vmem>>, vector<8x384xbf16>
    tpu.vector_store %arg8[%c16_157, %c0_158], %130 {strides = array<i32>} : memref<72x384xbf16, #tpu.memory_space<vmem>>, vector<8x384xbf16>,
    %c0_159 = arith.constant 0 : index
    %c127_160 = arith.constant 127 : index
    %132 = vector.load %arg9[%c0_159, %c127_160] : memref<8x640xbf16, #tpu.memory_space<vmem>>, vector<8x384xbf16>
    %c24_161 = arith.constant 24 : index
    %c0_162 = arith.constant 0 : index
    %133 = vector.load %arg8[%c24_161, %c0_162] : memref<72x384xbf16, #tpu.memory_space<vmem>>, vector<8x384xbf16>
    tpu.vector_store %arg8[%c24_161, %c0_162], %132 {strides = array<i32>} : memref<72x384xbf16, #tpu.memory_space<vmem>>, vector<8x384xbf16>,
    %c0_163 = arith.constant 0 : index
    %c128_164 = arith.constant 128 : index
    %134 = vector.load %arg9[%c0_163, %c128_164] : memref<8x640xbf16, #tpu.memory_space<vmem>>, vector<8x384xbf16>
    %c32_165 = arith.constant 32 : index
    %c0_166 = arith.constant 0 : index
    %135 = vector.load %arg8[%c32_165, %c0_166] : memref<72x384xbf16, #tpu.memory_space<vmem>>, vector<8x384xbf16>
    tpu.vector_store %arg8[%c32_165, %c0_166], %134 {strides = array<i32>} : memref<72x384xbf16, #tpu.memory_space<vmem>>, vector<8x384xbf16>,
    %c0_167 = arith.constant 0 : index
    %c129_168 = arith.constant 129 : index
    %136 = vector.load %arg9[%c0_167, %c129_168] : memref<8x640xbf16, #tpu.memory_space<vmem>>, vector<8x384xbf16>
    %c40_169 = arith.constant 40 : index
    %c0_170 = arith.constant 0 : index
    %137 = vector.load %arg8[%c40_169, %c0_170] : memref<72x384xbf16, #tpu.memory_space<vmem>>, vector<8x384xbf16>
    tpu.vector_store %arg8[%c40_169, %c0_170], %136 {strides = array<i32>} : memref<72x384xbf16, #tpu.memory_space<vmem>>, vector<8x384xbf16>,
    %c0_171 = arith.constant 0 : index
    %c145_172 = arith.constant 145 : index
    %138 = vector.load %arg9[%c0_171, %c145_172] : memref<8x640xbf16, #tpu.memory_space<vmem>>, vector<8x384xbf16>
    %c48_173 = arith.constant 48 : index
    %c0_174 = arith.constant 0 : index
    %139 = vector.load %arg8[%c48_173, %c0_174] : memref<72x384xbf16, #tpu.memory_space<vmem>>, vector<8x384xbf16>
    tpu.vector_store %arg8[%c48_173, %c0_174], %138 {strides = array<i32>} : memref<72x384xbf16, #tpu.memory_space<vmem>>, vector<8x384xbf16>,
    %c0_175 = arith.constant 0 : index
    %c146_176 = arith.constant 146 : index
    %140 = vector.load %arg9[%c0_175, %c146_176] : memref<8x640xbf16, #tpu.memory_space<vmem>>, vector<8x384xbf16>
    %c56_177 = arith.constant 56 : index
    %c0_178 = arith.constant 0 : index
    %141 = vector.load %arg8[%c56_177, %c0_178] : memref<72x384xbf16, #tpu.memory_space<vmem>>, vector<8x384xbf16>
    tpu.vector_store %arg8[%c56_177, %c0_178], %140 {strides = array<i32>} : memref<72x384xbf16, #tpu.memory_space<vmem>>, vector<8x384xbf16>,
    %c0_179 = arith.constant 0 : index
    %c147_180 = arith.constant 147 : index
    %142 = vector.load %arg9[%c0_179, %c147_180] : memref<8x640xbf16, #tpu.memory_space<vmem>>, vector<8x384xbf16>
    %c64_181 = arith.constant 64 : index
    %c0_182 = arith.constant 0 : index
    %143 = vector.load %arg8[%c64_181, %c0_182] : memref<72x384xbf16, #tpu.memory_space<vmem>>, vector<8x384xbf16>
    tpu.vector_store %arg8[%c64_181, %c0_182], %142 {strides = array<i32>} : memref<72x384xbf16, #tpu.memory_space<vmem>>, vector<8x384xbf16>,
    %c0_183 = arith.constant 0 : index
    %c0_184 = arith.constant 0 : index
    %144 = vector.load %arg8[%c0_183, %c0_184] : memref<72x384xbf16, #tpu.memory_space<vmem>>, vector<72x384xbf16>
    %cst_185 = arith.constant dense<0.000000e+00> : vector<8x384xf32>
    %145 = tpu.matmul %5, %144, %cst_185 {dimension_numbers = #tpu.dot_dimension_numbers<[1], [0], [0], [1], [0, 0, 1, 1], [], []>} : vector<8x72xbf16>, vector<72x384xbf16>, vector<8x384xf32> -> vector<8x384xf32>
    %146 = vector.broadcast %7 : vector<8x1xf32> to vector<8x384xf32>
    %147 = arith.addf %145, %146 : vector<8x384xf32>
    %c1_186 = arith.constant 1 : index
    %c0_187 = arith.constant 0 : index
    %c128_188 = arith.constant 128 : index
    %148 = vector.load %arg1[%c1_186, %c0_187, %c128_188] : memref<2x8x640xbf16, #tpu.memory_space<vmem>>, vector<1x8x384xbf16>
    %149 = vector.shape_cast %148 : vector<1x8x384xbf16> to vector<8x384xbf16>
    %150 = arith.extf %149 : vector<8x384xbf16> to vector<8x384xf32>
    %151 = arith.addf %147, %150 : vector<8x384xf32>
    %cst_189 = arith.constant 0.000000e+00 : f32
    %152 = vector.broadcast %cst_189 : f32 to vector<8x384xf32>
    %153 = arith.maximumf %151, %152 : vector<8x384xf32>
    %c1_190 = arith.constant 1 : index
    %c0_191 = arith.constant 0 : index
    %c0_192 = arith.constant 0 : index
    %154 = vector.load %arg7[%c1_190, %c0_191, %c0_192] : memref<2x8x384xf32, #tpu.memory_space<vmem>>, vector<1x8x384xf32>
    %155 = vector.shape_cast %154 : vector<1x8x384xf32> to vector<8x384xf32>
    %156 = vector.shape_cast %153 : vector<8x384xf32> to vector<1x8x384xf32>
    tpu.vector_store %arg7[%c1_190, %c0_191, %c0_192], %156 {strides = array<i32>} : memref<2x8x384xf32, #tpu.memory_space<vmem>>, vector<1x8x384xf32>,
    return
  }
  func.func @transform_0(%arg0: i32) -> (i32, i32, i32) {
    %c0_i32 = arith.constant 0 : i32
    %c0_i32_0 = arith.constant 0 : i32
    %c0_i32_1 = arith.constant 0 : i32
    return %arg0, %c0_i32, %c0_i32_0 : i32, i32, i32
  }
  func.func @transform_1(%arg0: i32) -> (i32, i32) {
    %c0_i32 = arith.constant 0 : i32
    %c0_i32_0 = arith.constant 0 : i32
    %c0_i32_1 = arith.constant 0 : i32
    return %c0_i32, %c0_i32_0 : i32, i32
  }
  func.func @transform_2(%arg0: i32) -> (i32, i32) {
    %c0_i32 = arith.constant 0 : i32
    %c0_i32_0 = arith.constant 0 : i32
    %c0_i32_1 = arith.constant 0 : i32
    return %c0_i32, %c0_i32_0 : i32, i32
  }
  func.func @transform_3(%arg0: i32) -> (i32, i32) {
    %c0_i32 = arith.constant 0 : i32
    %c0_i32_0 = arith.constant 0 : i32
    %c0_i32_1 = arith.constant 0 : i32
    return %c0_i32, %c0_i32_0 : i32, i32
  }
  func.func @transform_4(%arg0: i32) -> (i32, i32) {
    %c0_i32 = arith.constant 0 : i32
    %c0_i32_0 = arith.constant 0 : i32
    %c0_i32_1 = arith.constant 0 : i32
    return %c0_i32, %c0_i32_0 : i32, i32
  }
  func.func @transform_5(%arg0: i32) -> (i32, i32) {
    %c0_i32 = arith.constant 0 : i32
    %c0_i32_0 = arith.constant 0 : i32
    %c0_i32_1 = arith.constant 0 : i32
    return %c0_i32, %c0_i32_0 : i32, i32
  }
  func.func @transform_6(%arg0: i32) -> (i32, i32, i32) {
    %c0_i32 = arith.constant 0 : i32
    %c0_i32_0 = arith.constant 0 : i32
    %c0_i32_1 = arith.constant 0 : i32
    return %arg0, %c0_i32, %c0_i32_0 : i32, i32, i32
  }
}

</mosaic_0001>

<bundles_post_ra>
// kernel: tpu_custom_call.1
= control target key start
LH: loop header
LB: loop body
LE: loop exit
PB: predicated region body
PF: predicated region fallthrough
CT: control target
= control target key end

     0   :  { %11 = vsyncpa [#allocation5], 0  ;;  %s2180_s0 = inlined_call_operand.hbm [shape: bf16[2,8,640], index: 0, kind: input, shape index: {}]   ;;  %s2181_s1 = inlined_call_operand.vmem [shape: bf16[8,72], index: 1, kind: input, shape index: {}]   ;;  %s2182_s2 = inlined_call_operand.vmem [shape: bf16[8,72], index: 2, kind: input, shape index: {}]   ;;  %s2183_s3 = inlined_call_operand.vmem [shape: f32[8,1], index: 3, kind: input, shape index: {}]   ;;  %s2184_s4 = inlined_call_operand.vmem [shape: f32[8,1], index: 4, kind: input, shape index: {}]   ;;  %s2185_s5 = inlined_call_operand.vmem [shape: f32[1,384], index: 5, kind: input, shape index: {}]   ;;  %s2186_s6 = inlined_call_operand.hbm [shape: f32[2,8,384], index: 6, kind: output, shape index: {}]  }
   0x1   :  { %12 = vsyncpa [#allocation6], 0  ;;  %s1750_s21 = smov [#allocation4]   ;;  %s1702_s25 = scalar_lea.hbm %s2180_s0, 640 }
   0x2   :  { %s18_s22 = sshll.u32 %s1750_s21, 4  ;;  %p1703_p0 = scmp.ne.s32.totalorder %s2180_s0, %s1702_s25  ;;  %s19_s22 = int_to_ptr.vmem [resolvable:$true] %s18_s22 }
   0x3   :  { %p1706_p1 = scmp.lt.u32.totalorder %s1702_s25, %s2180_s0 }
   0x5   :  { %p1708_p2 = pnand %p1706_p1, %p1703_p0 }
   0x7   :  { %1711 = shalt.err (!%p1708_p2)
}
   0x8   :  { %s1712_s30 = scalar_lea.vmem %s19_s22, 640  ;;  %p1717_p4 = scmp.lt.s32.totalorder %s19_s22, %s19_s22 }
   0x9   :  { %p1713_p3 = scmp.ne.s32.totalorder %s19_s22, %s1712_s30  ;;  %p1718_p5 = scmp.lt.s32.totalorder %s1712_s30, %s1712_s30 }
   0xb   :  { %p1719_p6 = por %p1718_p5, %p1717_p4 }
   0xd   :  { %p1720_p7 = pnand %p1719_p6, %p1713_p3 }
   0xf   :  { %1723 = shalt.err (!%p1720_p7)
}
  0x10   :  { %s1751_s7 = smov 320   ;;  %s1752_s8 = smov 20  }
  0x11   :  { %24 = dma.hbm_to_vmem [thread:$0]  %s2180_s0, 640, %s19_s22, [#allocation5], %s1751_s7, %s1751_s7, %s1752_s8  }
  0x12   :  { %1746 = dma.done.wait [#allocation5], 640  }
  0x13   :  { %1747 = vsyncadd [#allocation5], 4294966656  ;;  %v65_v0 = vld [vmem:[#allocation4] sm:$0xff]  ;;  %s1753_s11 = smov 18   ;;  %s1754_s12 = smov 19   ;;  %v66_v1 = vld [vmem:[#allocation4 + $0x8] sm:$0xff] }
  0x14   :  { %69 = vrot.lane.b32.xlu1 %v65_v0, %s1753_s11  ;;  %50 = vrot.lane.b32.xlu0 %v65_v0, %s1754_s12  ;;  %v1755_v2 = vmov 0.0   ;;  %v120_v3 = vld [vmem:[#allocation4 + $0xc] sm:$0xf]  ;;  %s1756_s0 = smov 17   ;;  %s1757_s13 = smov 1   ;;  %v1823_v5 = vld [vmem:[#allocation4 + $0x4] sm:$0xff] }
  0x15   :  { %1598 = vmatprep.subr.bf16.mxu1 %v1755_v2  ;;  %122 = vst [vmem:[#allocation2 + $0x38] sm:$0xf] %v120_v3  ;;  %v124_v4 = vld [vmem:[#allocation4 + $0xc] sm:$0xff]  ;;  %s1758_s14 = smov 127   ;;  %s1759_s15 = smov 111   ;;  %v1761_v6 = vmov 0  }
  0x16   :  { %s1760_s16 = smov 110   ;;  %39 = vst [vmem:[#allocation3] sm:$0xf] %v1761_v6  ;;  %40 = vst [vmem:[#allocation3 + $0x10] sm:$0xf] %v1761_v6  ;;  %336 = vmatprep.mubr.bf16.mxu0 %v1761_v6  ;;  %1671 = vset.pattern.permute.xlu0 %v1761_v6  ;;  %s1762_s17 = smov 109  }
  0x17   :  { %vm1763_vm0 = vmmov 0   ;;  %v43_v7 = vld [vmem:[%s2183_s3] sm:$0xff]  ;;  %vm56_vm1 = vcmask 1043456   ;;  %vm76_vm2 = vcmask 146432   ;;  %vm58_vm3 = vcmask 154624  }
  0x18   :  { %71 = vrot.lane.b32.xlu1 %v66_v1, %s1753_s11  ;;  %52 = vrot.lane.b32.xlu0 %v66_v1, %s1754_s12  ;;  %vm94_vm4 = vcmask 138240   ;;  %vm112_vm5 = vcmask 7168   ;;  %vm134_vm6 = vcmask 1039360   ;;  %vm152_vm7 = vcmask 908288  }
  0x19   :  { %1608 = vmatprep.mubr.msk.bf16.mxu1 %vm1763_vm0, %v1755_v2  ;;  %vm170_vm8 = vcmask 900096   ;;  %vm188_vm9 = vcmask 891904   ;;  %vm290_vm10 = vcmask 588800  }
  0x1c   :  { %89 = vrot.lane.b32.xlu1 %v66_v1, %s1756_s0  ;;  %87 = vrot.lane.b32.xlu0 %v65_v0, %s1756_s0 }
  0x20   :  { %107 = vrot.lane.b32.xlu1 %v66_v1, %s1757_s13  ;;  %105 = vrot.lane.b32.xlu0 %v65_v0, %s1757_s13 }
  0x24   :  { %129 = vrot.lane.b32.xlu1 %v124_v4, %s1758_s14  ;;  %127 = vrot.lane.b32.xlu0 %v1823_v5, %s1758_s14 }
  0x28   :  { %147 = vrot.lane.b32.xlu1 %v124_v4, %s1759_s15  ;;  %145 = vrot.lane.b32.xlu0 %v1823_v5, %s1759_s15 }
  0x2c   :  { %165 = vrot.lane.b32.xlu1 %v124_v4, %s1760_s16  ;;  %163 = vrot.lane.b32.xlu0 %v1823_v5, %s1760_s16 }
  0x30   :  { %183 = vrot.lane.b32.xlu1 %v124_v4, %s1762_s17  ;;  %181 = vrot.lane.b32.xlu0 %v1823_v5, %s1762_s17 }
  0x34   :  { %215 = vperm.xlu0 %1671, %v43_v7  }
  0x86   :  { %v70_v8 = vpop.permute.xlu1 %69  ;;  %v51_v9 = vpop.permute.xlu0 %50 }
  0x87   :  { %v54_v10 = vrot.slane %v51_v9, 4  ;;  %v73_v13 = vrot.slane %v70_v8, 4 }
  0x8a   :  { %v72_v11 = vpop.permute.xlu1 %71  ;;  %v53_v12 = vpop.permute.xlu0 %52 }
  0x8b   :  { %v74_v14 = vrot.slane %v72_v11, 4  ;;  %v55_v15 = vrot.slane %v53_v12, 4 }
  0x8d   :  { %v75_v16 = vsel %vm56_vm1, %v73_v13, %v74_v14  ;;  %v78_v17 = vsel %vm76_vm2, %v72_v11, %v74_v14  ;;  %v57_v18 = vsel %vm56_vm1, %v54_v10, %v55_v15  ;;  %v60_v19 = vsel %vm58_vm3, %v53_v12, %v55_v15 }
  0x8e   :  { %v77_v20 = vsel %vm76_vm2, %v70_v8, %v75_v16  ;;  %82 = vst [vmem:[#allocation2 + $0x14] sm:$0xf] %v78_v17  ;;  %v59_v21 = vsel %vm58_vm3, %v51_v9, %v57_v18  ;;  %64 = vst [vmem:[#allocation2 + $0x8] sm:$0xf] %v60_v19  ;;  %v90_v22 = vpop.permute.xlu1 %89  ;;  %v88_v23 = vpop.permute.xlu0 %87  ;;  %v1880_v17 = vld [vmem:[%s2181_s1] sm:$0xf] }
  0x8f   :  { %v92_v24 = vrot.slane %v90_v22, 4  ;;  %v91_v25 = vrot.slane %v88_v23, 4  ;;  %v1489_v26 = vcombine.high %v59_v21, %v77_v20  ;;  %v1488_v27 = vcombine.low %v59_v21, %v77_v20  ;;  %v1892_v20 = vld [vmem:[#allocation4 + $0x14] sm:$0xff] }
  0x90   :  { %784 = vrot.lane.b32.xlu0 %v1892_v20, %s1754_s12 }
  0x91   :  { %v96_v28 = vsel %vm94_vm4, %v90_v22, %v92_v24  ;;  %304 = vmatprep.subr.bf16.mxu0 %v1489_v26  ;;  %v93_v31 = vsel %vm56_vm1, %v91_v25, %v92_v24 }
  0x92   :  { %100 = vst [vmem:[#allocation2 + $0x20] sm:$0xf] %v96_v28  ;;  %v108_v29 = vpop.permute.xlu1 %107  ;;  %v106_v30 = vpop.permute.xlu0 %105  ;;  %305 = vmatpush1.bf16.msra.mxu0 %v1488_v27  ;;  %v95_v37 = vsel %vm94_vm4, %v88_v23, %v93_v31 }
  0x93   :  { %v110_v32 = vrot.slane %v108_v29, 4  ;;  %v109_v33 = vrot.slane %v106_v30, 4 }
  0x95   :  { %v114_v34 = vsel %vm112_vm5, %v108_v29, %v110_v32  ;;  %v111_v35 = vsel %vm56_vm1, %v109_v33, %v110_v32  ;;  %v1672_v36 = vld [vmem:[#allocation2 + $0x8] ss:$12 sps:$4 sm:$0xff]  }
  0x96   :  { %118 = vst [vmem:[#allocation2 + $0x2c] sm:$0xf] %v114_v34  ;;  %v113_v38 = vsel %vm112_vm5, %v106_v30, %v111_v35  ;;  %v130_v39 = vpop.permute.xlu1 %129  ;;  %v128_v40 = vpop.permute.xlu0 %127  ;;  %1599 = vmatpush3.bf16.msra.mxu1 %v1672_v36  ;;  %v404_v30 = vlaneseq }
  0x97   :  { %v132_v41 = vrot.slane %v130_v39, 4  ;;  %v131_v42 = vrot.slane %v128_v40, 4  ;;  %v1492_v43 = vcombine.high %v95_v37, %v113_v38  ;;  %v1491_v44 = vcombine.low %v95_v37, %v113_v38  ;;  %1600 = vmatprep.subr.bf16.mxu1 %v1755_v2 }
  0x98   :  { %v405_v38 = vshrl.u32 %v404_v30, 7 }
  0x99   :  { %v136_v45 = vsel %vm134_vm6, %v130_v39, %v132_v41  ;;  %v133_v46 = vsel %vm56_vm1, %v131_v42, %v132_v41  ;;  %306 = vmatprep.subr.bf16.mxu0 %v1492_v43  ;;  %v45_v42 = vld [vmem:[%s2185_s5] sm:$0x7] }
  0x9a   :  { %140 = vst [vmem:[#allocation2 + $0x44] sm:$0xf] %v136_v45  ;;  %v135_v47 = vsel %vm134_vm6, %v128_v40, %v133_v46  ;;  %v148_v48 = vpop.permute.xlu1 %147  ;;  %v146_v49 = vpop.permute.xlu0 %145  ;;  %307 = vmatpush1.bf16.msra.mxu0 %v1491_v44  ;;  %v406_v41 = vsub.s32 0, %v405_v38  ;;  %v410_v43 = vsub.s32 1, %v405_v38 }
  0x9b   :  { %v150_v50 = vrot.slane %v148_v48, 4  ;;  %v149_v51 = vrot.slane %v146_v49, 4  ;;  %v1495_v52 = vcombine.high %v1823_v5, %v135_v47  ;;  %v1494_v53 = vcombine.low %v1823_v5, %v135_v47 }
  0x9c   :  { %v1904_v45 = vrot.slane %v45_v42, %v406_v41 }
  0x9d   :  { %v154_v54 = vsel %vm152_vm7, %v148_v48, %v150_v50  ;;  %v1673_v55 = vld [vmem:[#allocation2 + $0x20] ss:$12 sps:$4 sm:$0xff]   ;;  %308 = vmatprep.subr.bf16.mxu0 %v1495_v52  ;;  %v151_v58 = vsel %vm56_vm1, %v149_v51, %v150_v50  ;;  %v1906_v48 = vrot.slane %v45_v42, %v410_v43 }
  0x9e   :  { %158 = vst [vmem:[#allocation2 + $0x50] sm:$0xf] %v154_v54  ;;  %v166_v56 = vpop.permute.xlu1 %165  ;;  %v164_v57 = vpop.permute.xlu0 %163  ;;  %309 = vmatpush1.bf16.msra.mxu0 %v1494_v53  ;;  %1601 = vmatpush3.bf16.msra.mxu1 %v1673_v55  ;;  %v153_v0 = vsel %vm152_vm7, %v146_v49, %v151_v58  ;;  %v414_v49 = vsub.s32 2, %v405_v38 }
  0x9f   :  { %v168_v59 = vrot.slane %v166_v56, 4  ;;  %v167_v60 = vrot.slane %v164_v57, 4  ;;  %1602 = vmatprep.subr.bf16.mxu1 %v1755_v2 }
  0xa1   :  { %v172_v61 = vsel %vm170_vm8, %v166_v56, %v168_v59  ;;  %v169_v62 = vsel %vm56_vm1, %v167_v60, %v168_v59  ;;  %v1674_v63 = vld [vmem:[#allocation2 + $0x38] ss:$12 sps:$4 sm:$0xff]   ;;  %v1910_v56 = vrot.slane %v45_v42, %v414_v49 }
  0xa2   :  { %176 = vst [vmem:[#allocation2 + $0x5c] sm:$0xf] %v172_v61  ;;  %v171_v1 = vsel %vm170_vm8, %v164_v57, %v169_v62  ;;  %v184_v3 = vpop.permute.xlu1 %183  ;;  %v182_v4 = vpop.permute.xlu0 %181  ;;  %1603 = vmatpush3.bf16.msra.mxu1 %v1674_v63 }
  0xa3   :  { %v186_v5 = vrot.slane %v184_v3, 4  ;;  %v185_v7 = vrot.slane %v182_v4, 4  ;;  %v1498_v8 = vcombine.high %v153_v0, %v171_v1  ;;  %v1497_v9 = vcombine.low %v153_v0, %v171_v1  ;;  %1604 = vmatprep.subr.bf16.mxu1 %v1755_v2 }
  0xa5   :  { %v190_v10 = vsel %vm188_vm9, %v184_v3, %v186_v5  ;;  %v187_v11 = vsel %vm56_vm1, %v185_v7, %v186_v5  ;;  %310 = vmatprep.subr.bf16.mxu0 %v1498_v8  ;;  %v1942_v3 = vld [vmem:[#allocation4 + $0x18] sm:$0xff]  ;;  %v853_v5 = vld [vmem:[#allocation4 + $0x20] sm:$0xff] }
  0xa6   :  { %194 = vst [vmem:[#allocation2 + $0x68] sm:$0xf] %v190_v10  ;;  %v189_v12 = vsel %vm188_vm9, %v182_v4, %v187_v11  ;;  %311 = vmatpush1.bf16.msra.mxu0 %v1497_v9  ;;  %v781_v4 = vld [vmem:[#allocation4 + $0x1c] sm:$0xff] }
  0xa7   :  { %v1501_v13 = vcombine.high %v189_v12, %v189_v12  ;;  %v1500_v14 = vcombine.low %v189_v12, %v189_v12 }
  0xa9   :  { %v1675_v15 = vld [vmem:[#allocation2 + $0x50] ss:$12 sps:$4 sm:$0xff]   ;;  %1503 = vmatprep.subr.msk.bf16.mxu0 %vm56_vm1, %v1501_v13  ;;  %v296_v16 = vsel %vm56_vm1, %v1500_v14, 0 }
  0xaa   :  { %313 = vmatpush1.bf16.msra.mxu0 %v296_v16  ;;  %1605 = vmatpush3.bf16.msra.mxu1 %v1675_v15 }
  0xab   :  { %1606 = vmatprep.subr.bf16.mxu1 %v1755_v2 }
  0xad   :  { %v1676_v18 = vld [vmem:[#allocation2 + $0x68] ss:$0 sps:$4 sm:$0xff]   ;;  %1504 = vmatmul.mubr.msk.bf16.vlgmr.msra.gmra.mrb[0].mxu0 %vm290_vm10, %v1880_v17 }
  0xae   :  { %716 = vmatprep.mubr.bf16.mxu0 %v1761_v6  ;;  %v302_v19 = vsel %vm56_vm1, %v1676_v18, 0 }
  0xaf   :  { %1607 = vmatpush3.bf16.msra.mxu1 %v302_v19 }
  0xb0   :  { %1612 = vmatprep.subr.bf16.mxu1 %v1755_v2 }
  0xb2   :  { %1609 = vmatmul.mubr.msk.bf16.vlgmr.msra.gmra.mrb[0].mxu1 %vm290_vm10, %v1880_v17 }
  0xb3   :  { %1622 = vmatprep.mubr.msk.bf16.mxu1 %vm1763_vm0, %v1755_v2  ;;  %v1896_v21 = vpop.permute.xlu0 %215 }
 0x102   :  { %v1960_v7 = vpop.permute.xlu0 %784 }
 0x180   :  { %v338_v22 = vpop.f32.mrb[0].mxu0 }
 0x181   :  { %v339_v23 = vadd.f32 %v338_v22, %v1896_v21  ;;  %v340_v24 = vpop.f32.mrb[1].mxu0  ;;  %v849_v22 = vld [vmem:[#allocation4 + $0x20] sm:$0xf] }
 0x182   :  { %v341_v25 = vadd.f32 %v340_v24, %v1896_v21  ;;  %v342_v26 = vpop.f32.mrb[2].mxu0 }
 0x183   :  { %v388_v27 = vmin.f32 %v339_v23, 0.0  ;;  %v343_v28 = vpop.f32.mrb[3].mxu0  ;;  %vm385_vm11 = vcmp.gt.f32.partialorder %v339_v23, 0.0 }
 0x184   :  { %v389_v29 = vmin.f32 %v341_v25, 0.0  ;;  %vm386_vm12 = vcmp.gt.f32.partialorder %v341_v25, 0.0 }
 0x185   :  { %v391_v31 = vmul.f32 1.442695, %v388_v27  ;;  %v379_v32 = vpop.f32.mrb[0].mxu1 }
 0x186   :  { %v393_v33 = vmul.f32 1.442695, %v389_v29  ;;  %v380_v34 = vadd.f32 %v379_v32, %v1896_v21  ;;  %v1610_v35 = vpop.f32.mrb[1].mxu1 }
 0x187   :  { %1690 = vpow2.f32 %v391_v31  ;;  %v382_v36 = vpop.f32.mrb[2].mxu1 }
 0x188   :  { %1692 = vpow2.f32 %v393_v33  ;;  %v390_v37 = vmin.f32 %v380_v34, 0.0  ;;  %v1611_v39 = vpop.f32.mrb[3].mxu1  ;;  %vm387_vm13 = vcmp.gt.f32.partialorder %v380_v34, 0.0 }
 0x18a   :  { %v395_v40 = vmul.f32 1.442695, %v390_v37 }
 0x18c   :  { %1694 = vpow2.f32 %v395_v40 }
 0x191   :  { %v1691_v44 = vpop.eup %1690 }
 0x192   :  { %v1693_v46 = vpop.eup %1692  ;;  %v1506_v47 = vadd.f32 -1.0, %v1691_v44 }
 0x193   :  { %v1507_v50 = vadd.f32 -1.0, %v1693_v46 }
 0x194   :  { %v400_v51 = vsel %vm385_vm11, %v339_v23, %v1506_v47 }
 0x195   :  { %v419_v52 = vmul.f32 %v1904_v45, %v400_v51  ;;  %v401_v53 = vsel %vm386_vm12, %v341_v25, %v1507_v50 }
 0x196   :  { %v420_v54 = vmul.f32 %v1906_v48, %v401_v53  ;;  %v1695_v55 = vpop.eup %1694 }
 0x197   :  { %v1508_v57 = vadd.f32 -1.0, %v1695_v55 }
 0x198   :  { %v1912_v58 = vpack.c.bf16 %v420_v54, %v419_v52 }
 0x199   :  { %v402_v59 = vsel %vm387_vm13, %v380_v34, %v1508_v57 }
 0x19a   :  { %435 = vst [vmem:[#allocation3 + $0x4] sm:$0xff] %v1912_v58  ;;  %v421_v60 = vmul.f32 %v1910_v56, %v402_v59 }
 0x19c   :  { %v1571_v61 = vpack.c.bf16 %v421_v60, %v421_v60 }
 0x19e   :  { %436 = vst [vmem:[#allocation3 + $0xc] sm:$0xf] %v1571_v61 }
 0x1a1   :  { %v454_v62 = vld [vmem:[#allocation3] sm:$0xff] }
 0x1a2   :  { %458 = vrot.lane.b32.xlu0 %v454_v62, %s1753_s11 }
 0x1a5   :  { %v510_v63 = vld [vmem:[#allocation3 + $0xc] sm:$0xff] }
 0x1a6   :  { %475 = vrot.lane.b32.xlu0 %v454_v62, %s1756_s0  ;;  %v506_v0 = vld [vmem:[#allocation3 + $0xc] sm:$0xf]  ;;  %515 = vrot.lane.b32.xlu1 %v510_v63, %s1758_s14 }
 0x1a7   :  { %508 = vst [vmem:[#allocation2 + $0x38] sm:$0xf] %v506_v0  ;;  %v438_v1 = vld [vmem:[#allocation3 + $0x8] sm:$0xff] }
 0x1aa   :  { %492 = vrot.lane.b32.xlu0 %v454_v62, %s1757_s13  ;;  %532 = vrot.lane.b32.xlu1 %v510_v63, %s1759_s15 }
 0x1ae   :  { %801 = vrot.lane.b32.xlu0 %v1892_v20, %s1753_s11  ;;  %549 = vrot.lane.b32.xlu1 %v510_v63, %s1760_s16 }
 0x1b2   :  { %818 = vrot.lane.b32.xlu0 %v1892_v20, %s1756_s0  ;;  %566 = vrot.lane.b32.xlu1 %v510_v63, %s1762_s17 }
 0x1b6   :  { %513 = vrot.lane.b32.xlu0 %v1912_v58, %s1758_s14  ;;  %441 = vrot.lane.b32.xlu1 %v454_v62, %s1754_s12 }
 0x1ba   :  { %530 = vrot.lane.b32.xlu0 %v1912_v58, %s1759_s15  ;;  %443 = vrot.lane.b32.xlu1 %v438_v1, %s1754_s12 }
 0x1be   :  { %547 = vrot.lane.b32.xlu0 %v1912_v58, %s1760_s16  ;;  %460 = vrot.lane.b32.xlu1 %v438_v1, %s1753_s11 }
 0x1c2   :  { %564 = vrot.lane.b32.xlu0 %v1912_v58, %s1762_s17  ;;  %477 = vrot.lane.b32.xlu1 %v438_v1, %s1756_s0 }
 0x1c6   :  { %835 = vrot.lane.b32.xlu0 %v1892_v20, %s1757_s13  ;;  %494 = vrot.lane.b32.xlu1 %v438_v1, %s1757_s13 }
 0x1ca   :  { %856 = vrot.lane.b32.xlu0 %v1942_v3, %s1758_s14  ;;  %786 = vrot.lane.b32.xlu1 %v781_v4, %s1754_s12 }
 0x1ce   :  { %873 = vrot.lane.b32.xlu0 %v1942_v3, %s1759_s15  ;;  %803 = vrot.lane.b32.xlu1 %v781_v4, %s1753_s11 }
 0x1d2   :  { %890 = vrot.lane.b32.xlu0 %v1942_v3, %s1760_s16  ;;  %820 = vrot.lane.b32.xlu1 %v781_v4, %s1756_s0 }
 0x1d6   :  { %907 = vrot.lane.b32.xlu0 %v1942_v3, %s1762_s17  ;;  %837 = vrot.lane.b32.xlu1 %v781_v4, %s1757_s13 }
 0x1da   :  { %858 = vrot.lane.b32.xlu1 %v853_v5, %s1758_s14 }
 0x1de   :  { %875 = vrot.lane.b32.xlu1 %v853_v5, %s1759_s15 }
 0x1e2   :  { %892 = vrot.lane.b32.xlu1 %v853_v5, %s1760_s16 }
 0x1e6   :  { %909 = vrot.lane.b32.xlu1 %v853_v5, %s1762_s17 }
 0x214   :  { %v459_v8 = vpop.permute.xlu0 %458 }
 0x215   :  { %v462_v37 = vrot.slane %v459_v8, 4 }
 0x218   :  { %v1962_v9 = vpop.permute.xlu0 %475  ;;  %v516_v10 = vpop.permute.xlu1 %515 }
 0x219   :  { %v518_v11 = vrot.slane %v516_v10, 4  ;;  %v479_v52 = vrot.slane %v1962_v9, 4 }
 0x21b   :  { %v521_v12 = vsel %vm134_vm6, %v516_v10, %v518_v11 }
 0x21c   :  { %v493_v13 = vpop.permute.xlu0 %492  ;;  %525 = vst [vmem:[#allocation2 + $0x44] sm:$0xf] %v521_v12  ;;  %v1965_v14 = vpop.permute.xlu1 %532 }
 0x21d   :  { %v535_v15 = vrot.slane %v1965_v14, 4  ;;  %v496_v59 = vrot.slane %v493_v13, 4 }
 0x21f   :  { %v538_v16 = vsel %vm152_vm7, %v1965_v14, %v535_v15 }
 0x220   :  { %v1972_v18 = vpop.permute.xlu0 %801  ;;  %542 = vst [vmem:[#allocation2 + $0x50] sm:$0xf] %v538_v16  ;;  %v550_v19 = vpop.permute.xlu1 %549 }
 0x221   :  { %v552_v20 = vrot.slane %v550_v19, 4 }
 0x223   :  { %v555_v23 = vsel %vm170_vm8, %v550_v19, %v552_v20  ;;  %v1977_v25 = vld [vmem:[#allocation2 + $0x38] ss:$12 sps:$4 sm:$0xff]  }
 0x224   :  { %v1975_v24 = vpop.permute.xlu0 %818  ;;  %559 = vst [vmem:[#allocation2 + $0x5c] sm:$0xf] %v555_v23  ;;  %v1979_v26 = vpop.permute.xlu1 %566  ;;  %851 = vst [vmem:[#allocation2 + $0x38] sm:$0xf] %v849_v22 }
 0x225   :  { %v569_v27 = vrot.slane %v1979_v26, 4 }
 0x227   :  { %v572_v28 = vsel %vm188_vm9, %v1979_v26, %v569_v27 }
 0x228   :  { %v514_v29 = vpop.permute.xlu0 %513  ;;  %576 = vst [vmem:[#allocation2 + $0x68] sm:$0xf] %v572_v28  ;;  %v442_v30 = vpop.permute.xlu1 %441 }
 0x229   :  { %v445_v34 = vrot.slane %v442_v30, 4  ;;  %v517_v44 = vrot.slane %v514_v29, 4 }
 0x22b   :  { %v519_v54 = vsel %vm56_vm1, %v517_v44, %v518_v11 }
 0x22c   :  { %v444_v31 = vpop.permute.xlu1 %443  ;;  %v1986_v32 = vpop.permute.xlu0 %530  ;;  %v520_v63 = vsel %vm134_vm6, %v514_v29, %v519_v54 }
 0x22d   :  { %v446_v33 = vrot.slane %v444_v31, 4  ;;  %v534_v0 = vrot.slane %v1986_v32, 4 }
 0x22f   :  { %v449_v35 = vsel %vm58_vm3, %v444_v31, %v446_v33  ;;  %v447_v38 = vsel %vm56_vm1, %v445_v34, %v446_v33  ;;  %v536_v31 = vsel %vm56_vm1, %v534_v0, %v535_v15 }
 0x230   :  { %453 = vst [vmem:[#allocation2 + $0x8] sm:$0xf] %v449_v35  ;;  %v461_v36 = vpop.permute.xlu1 %460  ;;  %v548_v40 = vpop.permute.xlu0 %547  ;;  %v448_v43 = vsel %vm58_vm3, %v442_v30, %v447_v38  ;;  %v537_v14 = vsel %vm152_vm7, %v1986_v32, %v536_v31 }
 0x231   :  { %v463_v39 = vrot.slane %v461_v36, 4  ;;  %v551_v61 = vrot.slane %v548_v40, 4 }
 0x233   :  { %v464_v41 = vsel %vm56_vm1, %v462_v37, %v463_v39  ;;  %v466_v42 = vsel %vm76_vm2, %v461_v36, %v463_v39  ;;  %v553_v23 = vsel %vm56_vm1, %v551_v61, %v552_v20  ;;  %v1517_v36 = vcombine.low %v1912_v58, %v520_v63 }
 0x234   :  { %v465_v46 = vsel %vm76_vm2, %v459_v8, %v464_v41  ;;  %470 = vst [vmem:[#allocation2 + $0x14] sm:$0xf] %v466_v42  ;;  %v478_v47 = vpop.permute.xlu1 %477  ;;  %v565_v57 = vpop.permute.xlu0 %564  ;;  %v805_v37 = vrot.slane %v1972_v18, 4 }
 0x235   :  { %v480_v49 = vrot.slane %v478_v47, 4  ;;  %v1512_v50 = vcombine.high %v448_v43, %v465_v46  ;;  %v1511_v51 = vcombine.low %v448_v43, %v465_v46  ;;  %v568_v12 = vrot.slane %v565_v57, 4 }
 0x236   :  { %v788_v43 = vrot.slane %v1960_v7, 4 }
 0x237   :  { %v483_v53 = vsel %vm94_vm4, %v478_v47, %v480_v49  ;;  %684 = vmatprep.subr.bf16.mxu0 %v1512_v50  ;;  %v481_v60 = vsel %vm56_vm1, %v479_v52, %v480_v49  ;;  %v578_v5 = vld [vmem:[#allocation2 + $0x8] sm:$0xf]  ;;  %v570_v20 = vsel %vm56_vm1, %v568_v12, %v569_v27 }
 0x238   :  { %487 = vst [vmem:[#allocation2 + $0x20] sm:$0xf] %v483_v53  ;;  %v495_v55 = vpop.permute.xlu1 %494  ;;  %685 = vmatpush1.bf16.msra.mxu0 %v1511_v51  ;;  %v482_v10 = vsel %vm94_vm4, %v1962_v9, %v481_v60  ;;  %v836_v22 = vpop.permute.xlu0 %835  ;;  %v1518_v9 = vcombine.high %v1912_v58, %v520_v63  ;;  %v571_v38 = vsel %vm188_vm9, %v565_v57, %v570_v20 }
 0x239   :  { %v497_v62 = vrot.slane %v495_v55, 4  ;;  %v1523_v46 = vcombine.low %v571_v38, %v571_v38  ;;  %v839_v50 = vrot.slane %v836_v22, 4  ;;  %v1524_v51 = vcombine.high %v571_v38, %v571_v38 }
 0x23b   :  { %v498_v1 = vsel %vm56_vm1, %v496_v59, %v497_v62  ;;  %v500_v4 = vsel %vm112_vm5, %v495_v55, %v497_v62  ;;  %v580_v8 = vld [vmem:[#allocation2 + $0x14] sm:$0xf]  ;;  %v822_v55 = vrot.slane %v1975_v24, 4  ;;  %v676_v61 = vsel %vm56_vm1, %v1523_v46, 0 }
 0x23c   :  { %v499_v11 = vsel %vm112_vm5, %v493_v13, %v498_v1  ;;  %504 = vst [vmem:[#allocation2 + $0x2c] sm:$0xf] %v500_v4  ;;  %v787_v16 = vpop.permute.xlu1 %786  ;;  %v1513_v19 = vcombine.low %v578_v5, %v580_v8  ;;  %v554_v13 = vsel %vm170_vm8, %v548_v40, %v553_v23  ;;  %v857_v15 = vpop.permute.xlu0 %856  ;;  %v1678_v5 = vld [vmem:[#allocation2 + $0x50] ss:$12 sps:$4 sm:$0xff]   ;;  %v1679_v8 = vld [vmem:[#allocation2 + $0x68] ss:$0 sps:$4 sm:$0xff]  }
 0x23d   :  { %v789_v28 = vrot.slane %v787_v16, 4  ;;  %v1515_v29 = vcombine.high %v482_v10, %v499_v11  ;;  %v1514_v30 = vcombine.low %v482_v10, %v499_v11  ;;  %v1521_v27 = vcombine.high %v537_v14, %v554_v13 }
 0x23e   :  { %1613 = vmatpush3.bf16.msra.mxu1 %v1513_v19  ;;  %v1520_v58 = vcombine.low %v537_v14, %v554_v13  ;;  %v860_v60 = vrot.slane %v857_v15, 4 }
 0x23f   :  { %v792_v33 = vsel %vm58_vm3, %v787_v16, %v789_v28  ;;  %1614 = vmatprep.subr.bf16.mxu1 %v1755_v2  ;;  %686 = vmatprep.subr.bf16.mxu0 %v1515_v29  ;;  %v582_v26 = vld [vmem:[#allocation2 + $0x20] sm:$0xf]  ;;  %v790_v47 = vsel %vm56_vm1, %v788_v43, %v789_v28 }
 0x240   :  { %796 = vst [vmem:[#allocation2 + $0x8] sm:$0xf] %v792_v33  ;;  %v804_v34 = vpop.permute.xlu1 %803  ;;  %687 = vmatpush1.bf16.msra.mxu0 %v1514_v30  ;;  %v2029_v54 = vpop.permute.xlu0 %873  ;;  %v791_v59 = vsel %vm58_vm3, %v1960_v7, %v790_v47  ;;  %v2045_v7 = vld [vmem:[%s2182_s2] sm:$0xf]  ;;  %v682_v30 = vsel %vm56_vm1, %v1679_v8, 0 }
 0x241   :  { %v806_v35 = vrot.slane %v804_v34, 4  ;;  %688 = vmatprep.subr.bf16.mxu0 %v1518_v9 }
 0x243   :  { %v809_v39 = vsel %vm76_vm2, %v804_v34, %v806_v35  ;;  %v584_v40 = vld [vmem:[#allocation2 + $0x2c] sm:$0xf]  ;;  %v807_v32 = vsel %vm56_vm1, %v805_v37, %v806_v35 }
 0x244   :  { %813 = vst [vmem:[#allocation2 + $0x14] sm:$0xf] %v809_v39  ;;  %v821_v41 = vpop.permute.xlu1 %820  ;;  %v1516_v42 = vcombine.low %v582_v26, %v584_v40  ;;  %689 = vmatpush1.bf16.msra.mxu0 %v1517_v36  ;;  %v808_v52 = vsel %vm76_vm2, %v1972_v18, %v807_v32  ;;  %v891_v11 = vpop.permute.xlu0 %890 }
 0x245   :  { %v823_v44 = vrot.slane %v821_v41, 4  ;;  %690 = vmatprep.subr.bf16.mxu0 %v1521_v27  ;;  %v1530_v0 = vcombine.high %v791_v59, %v808_v52  ;;  %v1529_v12 = vcombine.low %v791_v59, %v808_v52  ;;  %v894_v9 = vrot.slane %v891_v11, 4 }
 0x246   :  { %1615 = vmatpush3.bf16.msra.mxu1 %v1516_v42 }
 0x247   :  { %v826_v49 = vsel %vm94_vm4, %v821_v41, %v823_v44  ;;  %1616 = vmatprep.subr.bf16.mxu1 %v1755_v2  ;;  %v824_v18 = vsel %vm56_vm1, %v822_v55, %v823_v44 }
 0x248   :  { %830 = vst [vmem:[#allocation2 + $0x20] sm:$0xf] %v826_v49  ;;  %v838_v53 = vpop.permute.xlu1 %837  ;;  %691 = vmatpush1.bf16.msra.mxu0 %v1520_v58  ;;  %v825_v10 = vsel %vm94_vm4, %v1975_v24, %v824_v18  ;;  %v877_v24 = vrot.slane %v2029_v54, 4  ;;  %v908_v35 = vpop.permute.xlu0 %907 }
 0x249   :  { %v840_v57 = vrot.slane %v838_v53, 4  ;;  %1526 = vmatprep.subr.msk.bf16.mxu0 %vm56_vm1, %v1524_v51  ;;  %v911_v39 = vrot.slane %v908_v35, 4 }
 0x24a   :  { %1617 = vmatpush3.bf16.msra.mxu1 %v1977_v25 }
 0x24b   :  { %v841_v62 = vsel %vm56_vm1, %v839_v50, %v840_v57  ;;  %v843_v63 = vsel %vm112_vm5, %v838_v53, %v840_v57  ;;  %1618 = vmatprep.subr.bf16.mxu1 %v1755_v2  ;;  %v1680_v34 = vld [vmem:[#allocation2 + $0x8] ss:$12 sps:$4 sm:$0xff]  }
 0x24c   :  { %v842_v1 = vsel %vm112_vm5, %v836_v22, %v841_v62  ;;  %847 = vst [vmem:[#allocation2 + $0x2c] sm:$0xf] %v843_v63  ;;  %v859_v4 = vpop.permute.xlu1 %858  ;;  %693 = vmatpush1.bf16.msra.mxu0 %v676_v61 }
 0x24d   :  { %v861_v25 = vrot.slane %v859_v4, 4  ;;  %1019 = vmatprep.subr.bf16.mxu0 %v1530_v0  ;;  %v1533_v22 = vcombine.high %v825_v10, %v842_v1  ;;  %v1532_v31 = vcombine.low %v825_v10, %v842_v1 }
 0x24e   :  { %1619 = vmatpush3.bf16.msra.mxu1 %v1678_v5 }
 0x24f   :  { %v862_v16 = vsel %vm56_vm1, %v860_v60, %v861_v25  ;;  %v864_v19 = vsel %vm134_vm6, %v859_v4, %v861_v25  ;;  %1620 = vmatprep.subr.bf16.mxu1 %v1755_v2  ;;  %1527 = vmatmul.mubr.msk.bf16.vlgmr.msra.gmra.mrb[4].mxu0 %vm290_vm10, %v2045_v7 }
 0x250   :  { %v863_v23 = vsel %vm134_vm6, %v857_v15, %v862_v16  ;;  %868 = vst [vmem:[#allocation2 + $0x44] sm:$0xf] %v864_v19  ;;  %v876_v28 = vpop.permute.xlu1 %875  ;;  %1020 = vmatpush1.bf16.msra.mxu0 %v1529_v12  ;;  %1051 = vmatprep.mubr.bf16.mxu0 %v1761_v6 }
 0x251   :  { %v878_v29 = vrot.slane %v876_v28, 4  ;;  %1021 = vmatprep.subr.bf16.mxu0 %v1533_v22  ;;  %v1536_v13 = vcombine.high %v1942_v3, %v863_v23  ;;  %v1535_v36 = vcombine.low %v1942_v3, %v863_v23 }
 0x252   :  { %1621 = vmatpush3.bf16.msra.mxu1 %v682_v30 }
 0x253   :  { %v881_v33 = vsel %vm152_vm7, %v876_v28, %v878_v29  ;;  %1626 = vmatprep.subr.bf16.mxu1 %v1755_v2  ;;  %v879_v14 = vsel %vm56_vm1, %v877_v24, %v878_v29  ;;  %v1681_v41 = vld [vmem:[#allocation2 + $0x20] ss:$12 sps:$4 sm:$0xff]  }
 0x254   :  { %885 = vst [vmem:[#allocation2 + $0x50] sm:$0xf] %v881_v33  ;;  %v893_v20 = vpop.permute.xlu1 %892  ;;  %1022 = vmatpush1.bf16.msra.mxu0 %v1532_v31  ;;  %v880_v26 = vsel %vm152_vm7, %v2029_v54, %v879_v14 }
 0x255   :  { %v895_v15 = vrot.slane %v893_v20, 4  ;;  %1623 = vmatmul.mubr.msk.bf16.vlgmr.msra.gmra.mrb[4].mxu1 %vm290_vm10, %v2045_v7  ;;  %1023 = vmatprep.subr.bf16.mxu0 %v1536_v13 }
 0x256   :  { %1627 = vmatpush3.bf16.msra.mxu1 %v1680_v34  ;;  %1636 = vmatprep.mubr.msk.bf16.mxu1 %vm1763_vm0, %v1755_v2 }
 0x257   :  { %v896_v37 = vsel %vm56_vm1, %v894_v9, %v895_v15  ;;  %v898_v38 = vsel %vm170_vm8, %v893_v20, %v895_v15  ;;  %1628 = vmatprep.subr.bf16.mxu1 %v1755_v2  ;;  %v1682_v46 = vld [vmem:[#allocation2 + $0x38] ss:$12 sps:$4 sm:$0xff]  }
 0x258   :  { %v897_v40 = vsel %vm170_vm8, %v891_v11, %v896_v37  ;;  %902 = vst [vmem:[#allocation2 + $0x5c] sm:$0xf] %v898_v38  ;;  %v910_v27 = vpop.permute.xlu1 %909  ;;  %1024 = vmatpush1.bf16.msra.mxu0 %v1535_v36 }
 0x259   :  { %v912_v3 = vrot.slane %v910_v27, 4  ;;  %v1539_v42 = vcombine.high %v880_v26, %v897_v40  ;;  %v1538_v43 = vcombine.low %v880_v26, %v897_v40 }
 0x25a   :  { %1629 = vmatpush3.bf16.msra.mxu1 %v1681_v41 }
 0x25b   :  { %v913_v32 = vsel %vm56_vm1, %v911_v39, %v912_v3  ;;  %v915_v44 = vsel %vm188_vm9, %v910_v27, %v912_v3  ;;  %1630 = vmatprep.subr.bf16.mxu1 %v1755_v2  ;;  %1025 = vmatprep.subr.bf16.mxu0 %v1539_v42 }
 0x25c   :  { %v914_v58 = vsel %vm188_vm9, %v908_v35, %v913_v32  ;;  %919 = vst [vmem:[#allocation2 + $0x68] sm:$0xf] %v915_v44  ;;  %1026 = vmatpush1.bf16.msra.mxu0 %v1538_v43 }
 0x25d   :  { %v1542_v47 = vcombine.high %v914_v58, %v914_v58  ;;  %v1541_v49 = vcombine.low %v914_v58, %v914_v58 }
 0x25e   :  { %1631 = vmatpush3.bf16.msra.mxu1 %v1682_v46 }
 0x25f   :  { %1632 = vmatprep.subr.bf16.mxu1 %v1755_v2  ;;  %v1683_v50 = vld [vmem:[#allocation2 + $0x50] ss:$12 sps:$4 sm:$0xff]   ;;  %1544 = vmatprep.subr.msk.bf16.mxu0 %vm56_vm1, %v1542_v47  ;;  %v1011_v51 = vsel %vm56_vm1, %v1541_v49, 0 }
 0x260   :  { %1028 = vmatpush1.bf16.msra.mxu0 %v1011_v51 }
 0x262   :  { %1633 = vmatpush3.bf16.msra.mxu1 %v1683_v50 }
 0x263   :  { %1634 = vmatprep.subr.bf16.mxu1 %v1755_v2  ;;  %v1684_v52 = vld [vmem:[#allocation2 + $0x68] ss:$0 sps:$4 sm:$0xff]   ;;  %1545 = vmatmul.mubr.msk.bf16.vlgmr.msra.gmra.mrb[8].mxu0 %vm290_vm10, %v1880_v17 }
 0x264   :  { %1407 = vmatprep.mubr.bf16.mxu0 %v1761_v6  ;;  %v1017_v53 = vsel %vm56_vm1, %v1684_v52, 0 }
 0x266   :  { %1635 = vmatpush3.bf16.msra.mxu1 %v1017_v53 }
 0x267   :  { %1640 = vmatprep.subr.bf16.mxu1 %v1755_v2 }
 0x269   :  { %1637 = vmatmul.mubr.msk.bf16.vlgmr.msra.gmra.mrb[8].mxu1 %vm290_vm10, %v1880_v17 }
 0x26a   :  { %1650 = vmatprep.mubr.msk.bf16.mxu1 %vm1763_vm0, %v1755_v2 }
 0x322   :  { %v2090_v54 = vpop.f32.mrb[4].mxu0 }
 0x323   :  { %v2092_v55 = vpop.f32.mrb[5].mxu0 }
 0x324   :  { %v722_v57 = vpop.f32.mrb[6].mxu0 }
 0x325   :  { %v723_v59 = vpop.f32.mrb[7].mxu0 }
 0x328   :  { %v2094_v60 = vpop.f32.mrb[4].mxu1 }
 0x329   :  { %v1624_v6 = vpop.f32.mrb[5].mxu1 }
 0x32a   :  { %v762_v61 = vpop.f32.mrb[6].mxu1 }
 0x32b   :  { %v1625_v18 = vpop.f32.mrb[7].mxu1 }
 0x336   :  { %v1053_v62 = vpop.f32.mrb[8].mxu0 }
 0x337   :  { %v1054_v63 = vadd.f32 %v1053_v62, %v1896_v21  ;;  %v1055_v0 = vpop.f32.mrb[9].mxu0 }
 0x338   :  { %v1056_v17 = vadd.f32 %v1055_v0, %v1896_v21  ;;  %v1057_v1 = vpop.f32.mrb[10].mxu0 }
 0x339   :  { %v1103_v4 = vmin.f32 %v1054_v63, 0.0  ;;  %v1058_v5 = vpop.f32.mrb[11].mxu0  ;;  %vm1100_vm14 = vcmp.gt.f32.partialorder %v1054_v63, 0.0 }
 0x33a   :  { %v1104_v25 = vmin.f32 %v1056_v17, 0.0  ;;  %vm1101_vm15 = vcmp.gt.f32.partialorder %v1056_v17, 0.0 }
 0x33b   :  { %v1106_v8 = vmul.f32 1.442695, %v1103_v4 }
 0x33c   :  { %v1094_v10 = vpop.f32.mrb[8].mxu1  ;;  %v1108_v11 = vmul.f32 1.442695, %v1104_v25 }
 0x33d   :  { %v1095_v12 = vadd.f32 %v1094_v10, %v1896_v21  ;;  %1696 = vpow2.f32 %v1106_v8  ;;  %v1638_v16 = vpop.f32.mrb[9].mxu1 }
 0x33e   :  { %1698 = vpow2.f32 %v1108_v11  ;;  %v1097_v19 = vpop.f32.mrb[10].mxu1 }
 0x33f   :  { %v1105_v22 = vmin.f32 %v1095_v12, 0.0  ;;  %v1639_v23 = vpop.f32.mrb[11].mxu1  ;;  %vm1102_vm0 = vcmp.gt.f32.partialorder %v1095_v12, 0.0 }
 0x341   :  { %v1110_v28 = vmul.f32 1.442695, %v1105_v22 }
 0x343   :  { %1700 = vpow2.f32 %v1110_v28 }
 0x347   :  { %v1697_v24 = vpop.eup %1696 }
 0x348   :  { %v1699_v29 = vpop.eup %1698  ;;  %v1547_v30 = vadd.f32 -1.0, %v1697_v24 }
 0x349   :  { %v1548_v31 = vadd.f32 -1.0, %v1699_v29 }
 0x34a   :  { %v1115_v33 = vsel %vm1100_vm14, %v1054_v63, %v1547_v30 }
 0x34b   :  { %v1118_v9 = vmul.f32 %v1115_v33, %v1904_v45  ;;  %v1116_v13 = vsel %vm1101_vm15, %v1056_v17, %v1548_v31 }
 0x34c   :  { %v1119_v21 = vmul.f32 %v1116_v13, %v1906_v48 }
 0x34d   :  { %v1701_v20 = vpop.eup %1700 }
 0x34e   :  { %v1549_v34 = vadd.f32 -1.0, %v1701_v20  ;;  %v2101_v35 = vpack.c.bf16 %v1119_v21, %v1118_v9 }
 0x350   :  { %v1117_v14 = vsel %vm1102_vm0, %v1095_v12, %v1549_v34  ;;  %1134 = vst [vmem:[#allocation3 + $0x4] sm:$0xff] %v2101_v35 }
 0x351   :  { %v1120_v15 = vmul.f32 %v1117_v14, %v1910_v56  ;;  %v44_v56 = vld [vmem:[%s2184_s4] sm:$0xff]  ;;  %s1764_s4 = smov [#allocation7]  }
 0x352   :  { %s1476_s24 = sshll.u32 %s1764_s4, 4  ;;  %s1477_s24 = int_to_ptr.vmem [resolvable:$true] %s1476_s24 }
 0x353   :  { %v1573_v36 = vpack.c.bf16 %v1120_v15, %v1120_v15  ;;  %s1724_s25 = scalar_lea.vmem %s1477_s24, 768  ;;  %p1729_p9 = scmp.lt.s32.totalorder %s1477_s24, %s1477_s24 }
 0x354   :  { %p1725_p8 = scmp.ne.s32.totalorder %s1477_s24, %s1724_s25  ;;  %p1730_p10 = scmp.lt.s32.totalorder %s1724_s25, %s1724_s25 }
 0x355   :  { %1135 = vst [vmem:[#allocation3 + $0xc] sm:$0xf] %v1573_v36 }
 0x356   :  { %p1731_p11 = por %p1730_p10, %p1729_p9 }
 0x357   :  { %v1136_v37 = vld [vmem:[#allocation3] sm:$0xff] }
 0x358   :  { %1140 = vrot.lane.b32.xlu0 %v1136_v37, %s1754_s12  ;;  %p1732_p12 = pnand %p1731_p11, %p1725_p8 }
 0x35c   :  { %v1209_v38 = vld [vmem:[#allocation3 + $0xc] sm:$0xff]  ;;  %1157 = vrot.lane.b32.xlu0 %v1136_v37, %s1753_s11 }
 0x35d   :  { %v1205_v45 = vld [vmem:[#allocation3 + $0xc] sm:$0xf]  ;;  %1214 = vrot.lane.b32.xlu1 %v1209_v38, %s1758_s14 }
 0x35e   :  { %1207 = vst [vmem:[#allocation2 + $0x38] sm:$0xf] %v1205_v45  ;;  %v1137_v48 = vld [vmem:[#allocation3 + $0x8] sm:$0xff] }
 0x360   :  { %1174 = vrot.lane.b32.xlu0 %v1136_v37, %s1756_s0 }
 0x361   :  { %1142 = vrot.lane.b32.xlu1 %v1137_v48, %s1754_s12 }
 0x364   :  { %1191 = vrot.lane.b32.xlu0 %v1136_v37, %s1757_s13 }
 0x365   :  { %1159 = vrot.lane.b32.xlu1 %v1137_v48, %s1753_s11 }
 0x368   :  { %1212 = vrot.lane.b32.xlu0 %v2101_v35, %s1758_s14 }
 0x369   :  { %1176 = vrot.lane.b32.xlu1 %v1137_v48, %s1756_s0 }
 0x36c   :  { %1229 = vrot.lane.b32.xlu0 %v2101_v35, %s1759_s15 }
 0x36d   :  { %1193 = vrot.lane.b32.xlu1 %v1137_v48, %s1757_s13 }
 0x370   :  { %1246 = vrot.lane.b32.xlu0 %v2101_v35, %s1760_s16 }
 0x371   :  { %1231 = vrot.lane.b32.xlu1 %v1209_v38, %s1759_s15 }
 0x374   :  { %1263 = vrot.lane.b32.xlu0 %v2101_v35, %s1762_s17 }
 0x375   :  { %1248 = vrot.lane.b32.xlu1 %v1209_v38, %s1760_s16 }
 0x378   :  { %597 = vperm.xlu0 %1671, %v44_v56  }
 0x379   :  { %1265 = vrot.lane.b32.xlu1 %v1209_v38, %s1762_s17 }
 0x3ca   :  { %v1141_v39 = vpop.permute.xlu0 %1140 }
 0x3cb   :  { %v1144_v43 = vrot.slane %v1141_v39, 4 }
 0x3ce   :  { %v1158_v26 = vpop.permute.xlu0 %1157 }
 0x3cf   :  { %v1215_v40 = vpop.permute.xlu1 %1214  ;;  %v1161_v50 = vrot.slane %v1158_v26, 4 }
 0x3d0   :  { %v1217_v27 = vrot.slane %v1215_v40, 4 }
 0x3d2   :  { %v1220_v41 = vsel %vm134_vm6, %v1215_v40, %v1217_v27  ;;  %v1175_v3 = vpop.permute.xlu0 %1174 }
 0x3d3   :  { %1224 = vst [vmem:[#allocation2 + $0x44] sm:$0xf] %v1220_v41  ;;  %v1143_v42 = vpop.permute.xlu1 %1142  ;;  %v1178_v18 = vrot.slane %v1175_v3, 4 }
 0x3d4   :  { %v1145_v32 = vrot.slane %v1143_v42, 4 }
 0x3d6   :  { %v1146_v44 = vsel %vm56_vm1, %v1144_v43, %v1145_v32  ;;  %v1148_v58 = vsel %vm58_vm3, %v1143_v42, %v1145_v32  ;;  %v1192_v46 = vpop.permute.xlu0 %1191 }
 0x3d7   :  { %v1147_v47 = vsel %vm58_vm3, %v1141_v39, %v1146_v44  ;;  %1152 = vst [vmem:[#allocation2 + $0x8] sm:$0xf] %v1148_v58  ;;  %v1160_v49 = vpop.permute.xlu1 %1159  ;;  %v1195_v11 = vrot.slane %v1192_v46, 4 }
 0x3d8   :  { %v1162_v51 = vrot.slane %v1160_v49, 4 }
 0x3da   :  { %v1163_v52 = vsel %vm56_vm1, %v1161_v50, %v1162_v51  ;;  %v1165_v53 = vsel %vm76_vm2, %v1160_v49, %v1162_v51  ;;  %v1213_v57 = vpop.permute.xlu0 %1212  ;;  %v1687_v42 = vld [vmem:[#allocation2 + $0x38] ss:$12 sps:$4 sm:$0xff]   ;;  %v766_v49 = vld [vmem:[#allocation4 + $0xc] ss:$20 sps:$4 sm:$0xff]  }
 0x3db   :  { %v1164_v59 = vsel %vm76_vm2, %v1158_v26, %v1163_v52  ;;  %1169 = vst [vmem:[#allocation2 + $0x14] sm:$0xf] %v1165_v53  ;;  %v1177_v6 = vpop.permute.xlu1 %1176  ;;  %v1216_v61 = vrot.slane %v1213_v57, 4  ;;  %v769_v53 = vunpack.c.l.bf16 %v766_v49 }
 0x3dc   :  { %v1179_v62 = vrot.slane %v1177_v6, 4  ;;  %v1552_v63 = vcombine.low %v1147_v47, %v1164_v59  ;;  %v1553_v0 = vcombine.high %v1147_v47, %v1164_v59  ;;  %v765_v47 = vld [vmem:[#allocation4 + $0x4] sm:$0xff] }
 0x3dd   :  { %v1218_v17 = vsel %vm56_vm1, %v1216_v61, %v1217_v27  ;;  %v767_v51 = vunpack.c.l.bf16 %v765_v47  ;;  %v768_v52 = vunpack.c.h.bf16 %v765_v47 }
 0x3de   :  { %v1180_v1 = vsel %vm56_vm1, %v1178_v18, %v1179_v62  ;;  %v1182_v4 = vsel %vm94_vm4, %v1177_v6, %v1179_v62  ;;  %v1219_v5 = vsel %vm134_vm6, %v1213_v57, %v1218_v17  ;;  %v1230_v25 = vpop.permute.xlu0 %1229  ;;  %1375 = vmatprep.subr.bf16.mxu0 %v1553_v0 }
 0x3df   :  { %v1181_v8 = vsel %vm94_vm4, %v1175_v3, %v1180_v1  ;;  %1186 = vst [vmem:[#allocation2 + $0x20] sm:$0xf] %v1182_v4  ;;  %v1194_v10 = vpop.permute.xlu1 %1193  ;;  %1376 = vmatpush1.bf16.msra.mxu0 %v1552_v63  ;;  %v1233_v30 = vrot.slane %v1230_v25, 4  ;;  %v1559_v21 = vcombine.high %v2101_v35, %v1219_v5  ;;  %v1558_v37 = vcombine.low %v2101_v35, %v1219_v5  ;;  %v1456_v4 = vld [vmem:[#allocation4 + $0x18] sm:$0xff] }
 0x3e0   :  { %v1196_v12 = vrot.slane %v1194_v10, 4  ;;  %v1458_v5 = vunpack.c.l.bf16 %v1456_v4 }
 0x3e2   :  { %v1197_v16 = vsel %vm56_vm1, %v1195_v11, %v1196_v12  ;;  %v1199_v19 = vsel %vm112_vm5, %v1194_v10, %v1196_v12  ;;  %v1685_v22 = vld [vmem:[#allocation2 + $0x8] ss:$12 sps:$4 sm:$0xff]   ;;  %v1247_v24 = vpop.permute.xlu0 %1246 }
 0x3e3   :  { %v1198_v23 = vsel %vm112_vm5, %v1192_v46, %v1197_v16  ;;  %1203 = vst [vmem:[#allocation2 + $0x2c] sm:$0xf] %v1199_v19  ;;  %v1232_v28 = vpop.permute.xlu1 %1231  ;;  %1641 = vmatpush3.bf16.msra.mxu1 %v1685_v22  ;;  %v1250_v15 = vrot.slane %v1247_v24, 4  ;;  %v1460_v19 = vunpack.c.h.bf16 %v766_v49 }
 0x3e4   :  { %v1234_v29 = vrot.slane %v1232_v28, 4  ;;  %v1555_v31 = vcombine.low %v1181_v8, %v1198_v23  ;;  %v1556_v33 = vcombine.high %v1181_v8, %v1198_v23  ;;  %1642 = vmatprep.subr.bf16.mxu1 %v1755_v2 }
 0x3e6   :  { %v1237_v9 = vsel %vm152_vm7, %v1232_v28, %v1234_v29  ;;  %v1235_v13 = vsel %vm56_vm1, %v1233_v30, %v1234_v29  ;;  %1377 = vmatprep.subr.bf16.mxu0 %v1556_v33  ;;  %v1264_v36 = vpop.permute.xlu0 %1263 }
 0x3e7   :  { %1241 = vst [vmem:[#allocation2 + $0x50] sm:$0xf] %v1237_v9  ;;  %v1236_v20 = vsel %vm152_vm7, %v1230_v25, %v1235_v13  ;;  %v1249_v34 = vpop.permute.xlu1 %1248  ;;  %1378 = vmatpush1.bf16.msra.mxu0 %v1555_v31  ;;  %v1267_v40 = vrot.slane %v1264_v36, 4  ;;  %v1459_v25 = vunpack.c.h.bf16 %v1456_v4 }
 0x3e8   :  { %v1251_v14 = vrot.slane %v1249_v34, 4  ;;  %1379 = vmatprep.subr.bf16.mxu0 %v1559_v21 }
 0x3ea   :  { %v1254_v38 = vsel %vm170_vm8, %v1249_v34, %v1251_v14  ;;  %v1252_v45 = vsel %vm56_vm1, %v1250_v15, %v1251_v14  ;;  %v1686_v48 = vld [vmem:[#allocation2 + $0x20] ss:$12 sps:$4 sm:$0xff]  }
 0x3eb   :  { %1258 = vst [vmem:[#allocation2 + $0x5c] sm:$0xf] %v1254_v38  ;;  %v1253_v56 = vsel %vm170_vm8, %v1247_v24, %v1252_v45  ;;  %v1266_v39 = vpop.permute.xlu1 %1265  ;;  %1380 = vmatpush1.bf16.msra.mxu0 %v1558_v37  ;;  %1643 = vmatpush3.bf16.msra.mxu1 %v1686_v48 }
 0x3ec   :  { %v1268_v26 = vrot.slane %v1266_v39, 4  ;;  %v1561_v27 = vcombine.low %v1236_v20, %v1253_v56  ;;  %v1562_v41 = vcombine.high %v1236_v20, %v1253_v56  ;;  %1644 = vmatprep.subr.bf16.mxu1 %v1755_v2 }
 0x3ee   :  { %v1271_v3 = vsel %vm188_vm9, %v1266_v39, %v1268_v26  ;;  %v1269_v35 = vsel %vm56_vm1, %v1267_v40, %v1268_v26  ;;  %1381 = vmatprep.subr.bf16.mxu0 %v1562_v41 }
 0x3ef   :  { %1275 = vst [vmem:[#allocation2 + $0x68] sm:$0xf] %v1271_v3  ;;  %v1270_v43 = vsel %vm188_vm9, %v1264_v36, %v1269_v35  ;;  %1382 = vmatpush1.bf16.msra.mxu0 %v1561_v27  ;;  %1645 = vmatpush3.bf16.msra.mxu1 %v1687_v42 }
 0x3f0   :  { %v1565_v32 = vcombine.high %v1270_v43, %v1270_v43  ;;  %v1564_v44 = vcombine.low %v1270_v43, %v1270_v43  ;;  %1646 = vmatprep.subr.bf16.mxu1 %v1755_v2 }
 0x3f2   :  { %v1688_v58 = vld [vmem:[#allocation2 + $0x50] ss:$12 sps:$4 sm:$0xff]   ;;  %1567 = vmatprep.subr.msk.bf16.mxu0 %vm56_vm1, %v1565_v32  ;;  %v1367_v46 = vsel %vm56_vm1, %v1564_v44, 0 }
 0x3f3   :  { %1384 = vmatpush1.bf16.msra.mxu0 %v1367_v46  ;;  %1647 = vmatpush3.bf16.msra.mxu1 %v1688_v58 }
 0x3f4   :  { %1648 = vmatprep.subr.bf16.mxu1 %v1755_v2 }
 0x3f6   :  { %v1689_v50 = vld [vmem:[#allocation2 + $0x68] ss:$0 sps:$4 sm:$0xff]   ;;  %1568 = vmatmul.mubr.msk.bf16.vlgmr.msra.gmra.mrb[12].mxu0 %vm290_vm10, %v2045_v7 }
 0x3f7   :  { %v598_v57 = vpop.permute.xlu0 %597  ;;  %v1373_v59 = vsel %vm56_vm1, %v1689_v50, 0 }
 0x3f8   :  { %v719_v6 = vadd.f32 %v2090_v54, %v598_v57  ;;  %v721_v61 = vadd.f32 %v2092_v55, %v598_v57  ;;  %v760_v18 = vadd.f32 %v2094_v60, %v598_v57  ;;  %1649 = vmatpush3.bf16.msra.mxu1 %v1373_v59 }
 0x3fa   :  { %v770_v62 = vadd.f32 %v767_v51, %v719_v6  ;;  %v771_v63 = vadd.f32 %v768_v52, %v721_v61  ;;  %v772_v2 = vadd.f32 %v769_v53, %v760_v18 }
 0x3fb   :  { %1651 = vmatmul.mubr.msk.bf16.vlgmr.msra.gmra.mrb[12].mxu1 %vm290_vm10, %v2045_v7 }
 0x3fc   :  { %v773_v0 = vmax.f32 %v770_v62, 0.0  ;;  %v774_v17 = vmax.f32 %v771_v63, 0.0  ;;  %v775_v1 = vmax.f32 %v772_v2, 0.0 }
 0x3fe   :  { %776 = vst [vmem:[#allocation7] sm:$0xff] %v773_v0  ;;  %777 = vst [vmem:[#allocation7 + $0x8] sm:$0xff] %v774_v17 }
 0x3ff   :  { %778 = vst [vmem:[#allocation7 + $0x10] sm:$0xff] %v775_v1 }
 0x4c9   :  { %v1409_v54 = vpop.f32.mrb[12].mxu0 }
 0x4ca   :  { %v1410_v55 = vadd.f32 %v1409_v54, %v598_v57  ;;  %v1411_v8 = vpop.f32.mrb[13].mxu0 }
 0x4cb   :  { %v1412_v60 = vadd.f32 %v1411_v8, %v598_v57  ;;  %v1413_v10 = vpop.f32.mrb[14].mxu0 }
 0x4cc   :  { %v1461_v11 = vadd.f32 %v1458_v5, %v1410_v55  ;;  %v1414_v12 = vpop.f32.mrb[15].mxu0 }
 0x4cd   :  { %v1462_v16 = vadd.f32 %v1459_v25, %v1412_v60 }
 0x4ce   :  { %v1464_v22 = vmax.f32 %v1461_v11, 0.0  ;;  %v1450_v7 = vpop.f32.mrb[12].mxu1 }
 0x4cf   :  { %v1465_v23 = vmax.f32 %v1462_v16, 0.0  ;;  %v1451_v28 = vadd.f32 %v1450_v7, %v598_v57  ;;  %v1652_v24 = vpop.f32.mrb[13].mxu1 }
 0x4d0   :  { %1468 = vst [vmem:[#allocation7 + $0x18] sm:$0xff] %v1464_v22  ;;  %v1453_v29 = vpop.f32.mrb[14].mxu1 }
 0x4d1   :  { %1469 = vst [vmem:[#allocation7 + $0x20] sm:$0xff] %v1465_v23  ;;  %v1463_v30 = vadd.f32 %v1460_v19, %v1451_v28  ;;  %v1653_v31 = vpop.f32.mrb[15].mxu1 }
 0x4d3   :  { %v1466_v33 = vmax.f32 %v1463_v30, 0.0 }
 0x4d5   :  { %1470 = vst [vmem:[#allocation7 + $0x28] sm:$0xff] %v1466_v33 }
 0x4d6   :  { %1735 = shalt.err (!%p1732_p12)
}
 0x4d7   :  { %s1736_s28 = scalar_lea.hbm %s2186_s6, 768 }
 0x4d8   :  { %p1737_p13 = scmp.ne.s32.totalorder %s2186_s6, %s1736_s28  ;;  %p1740_p0 = scmp.lt.u32.totalorder %s1736_s28, %s2186_s6 }
 0x4da   :  { %p1742_p1 = pnand %p1740_p0, %p1737_p13 }
 0x4dc   :  { %1745 = shalt.err (!%p1742_p1)
}
 0x4dd   :  { %s1765_s9 = smov 384   ;;  %s1766_s10 = smov 24  }
 0x4de   :  { %1482 = dma.vmem_to_hbm [thread:$0]  %s1477_s24, 768, %s2186_s6, [#allocation6], %s1765_s9, %s1765_s9, %s1766_s10  }
 0x4df   :  { %1748 = dma.done.wait [#allocation6], 768  }
 0x4e0   :  { %1749 = vsyncadd [#allocation6], 4294966528 }
 0x4e1   :  { %1486 = vsyncpa [#allocation5], 1 }
 0x4e2   :  { %1487 = vsyncpa [#allocation6], 1 }

</bundles_post_ra>
